<compile_context>
chip_gen: v7x
topology: tpu7x:2x2x1
jax: 0.10.0
libtpu: 0.0.40
codegen_flags: <defaults>
</compile_context>

<pallas_src>
import functools
import math

import jax
import jax.numpy as jnp
import numpy as np
from jax.experimental import pallas as pl
from jax.experimental.pallas import tpu as pltpu


# ----------------------------- Pallas kernel -------------------------------
def _rits_kernel(seqs_ref, lab_train_ref, rows_ref, w_ext_ref,
                 loss_ref, pred_ref, imp_ref,
                 *, seq_len, hid, impute_weight, label_weight):
    B = lab_train_ref.shape[0]
    GN = 4 * hid

    vals = seqs_ref[0]            # (B, T)
    msks = seqs_ref[1]            # (B, T)
    dels = seqs_ref[2]            # (B, T)

    rows = rows_ref[...]          # (8, 4H) f32 packed parameter slab
    w_td = rows[0:1, :hid]        # TemporalDecay.W.T            (1, H)
    b_td = rows[1:2, :hid]        # TemporalDecay.b              (1, H)
    w_ih_x = rows[2:3, :]         # lstm.weight_ih[:, 0] row     (1, 4H)
    w_ih_m = rows[3:4, :]         # lstm.weight_ih[:, 1] row     (1, 4H)
    b_g = rows[4:5, :]            # b_ih + b_hh                  (1, 4H)
    w_out = rows[5:6, :hid]       # out.weight row               (1, H)
    b_reg = rows[6:7, 0:1]        # regression bias              (1, 1)
    b_out = rows[6:7, 1:2]        # out bias                     (1, 1)

    w_ext = w_ext_ref[...]        # (H, 4H+128) bf16: [W_hh.T | W_reg col | 0]

    # ---- loop-invariant work hoisted off the serial recurrence chain -------
    # gamma_t = exp(-relu(d_t * W_td.T + b_td)); depends only on inputs.
    gammas = [jnp.exp(-jnp.maximum(dels[:, t:t + 1] * w_td + b_td, 0.0))
              for t in range(seq_len)]                            # T x (B, H)
    # exact per-timestep masked-L1 denominators (single (1,T) divide, off-chain)
    inv_den = 1.0 / (jnp.sum(msks, axis=0, keepdims=True) + 1e-5)  # (1, T)
    lw = msks * inv_den                                            # (B, T)
    xs = [vals[:, t:t + 1] for t in range(seq_len)]
    ms = [msks[:, t:t + 1] for t in range(seq_len)]
    lws = [lw[:, t:t + 1] for t in range(seq_len)]

    h = jnp.zeros((B, hid), jnp.float32)
    c = jnp.zeros((B, hid), jnp.float32)
    x_loss_vec = jnp.zeros((B, 1), jnp.float32)

    # TODO(synk): if T grows beyond ~16-32, replace this unrolled loop with
    # lax.fori_loop (gammas in a (T,B,H) VMEM scratch) and stage imputations in
    # a VMEM scratch written in lane-dense chunks instead of per-step stores.
    for t in range(seq_len):                      # seq_len is static & small
        x = xs[t]                                 # (B, 1)
        m = ms[t]                                 # (B, 1)

        h = h * gammas[t]                         # temporal decay

        # One bf16 MXU pass produces both the 4H gate pre-activations and the
        # regression output x_h (extra folded column) -- no per-step XLU reduce.
        G = jnp.dot(h.astype(jnp.bfloat16), w_ext,
                    preferred_element_type=jnp.float32)            # (B, 4H+128)

        x_h = G[:, GN:GN + 1] + b_reg                              # (B, 1)
        x_c = m * x + (1.0 - m) * x_h

        # masked L1 contribution (precomputed weight; reduced once after loop)
        x_loss_vec = x_loss_vec + jnp.abs(x - x_h) * lws[t]

        # write this timestep's imputation directly (store slot is free)
        imp_ref[:, t:t + 1] = x_c

        # PyTorch LSTMCell, gate order (i, f, g, o):
        #   input contribution as two VPU broadcast FMAs (K=2 matmul removed),
        #   hidden contribution already in G from the folded matmul.
        gates = G[:, :GN] + x_c * w_ih_x + m * w_ih_m + b_g        # (B, 4H)

        sig = jax.nn.sigmoid(gates)               # one full-width EUP pass
        i_g = sig[:, 0 * hid:1 * hid]
        f_g = sig[:, 1 * hid:2 * hid]
        o_g = sig[:, 3 * hid:4 * hid]
        g_g = jnp.tanh(gates[:, 2 * hid:3 * hid])  # tanh only on g-gate slice
        c = f_g * c + i_g * g_g
        h = o_g * jnp.tanh(c)

    x_loss = jnp.sum(x_loss_vec)                  # single final reduce

    # classification head (runs once; VPU mul + reduce in f32) + stable BCE
    y_logit = jnp.sum(h * w_out, axis=-1, keepdims=True) + b_out   # (B, 1)
    labels = lab_train_ref[:, 0:1]
    is_train = lab_train_ref[:, 1:2]
    max_val = jnp.maximum(-y_logit, 0.0)
    bce = (y_logit - y_logit * labels + max_val
           + jnp.log(jnp.exp(-max_val) + jnp.exp(-y_logit - max_val)))
    y_loss = jnp.sum(bce * is_train) / (jnp.sum(is_train) + 1e-5)

    loss_ref[0] = x_loss * impute_weight + y_loss * label_weight   # SMEM scalar
    pred_ref[...] = jax.nn.sigmoid(y_logit)


# ------------------------------ JAX wrapper ---------------------------------
def rits_i_forward(values, masks, deltas, evals, eval_masks, labels, is_train,
                   params, impute_weight, label_weight):
    B, T, F = values.shape
    assert F == 1, "Rits_i uses input_size == 1"
    H = params["W_td"].shape[0]
    GN = 4 * H

    # ---- pack the 15 logical inputs into 4 arrays (4 DMAs total) ------------
    v2 = values[:, :, 0].astype(jnp.float32)
    m2 = masks[:, :, 0].astype(jnp.float32)
    d2 = deltas[:, :, 0].astype(jnp.float32)
    seqs = jnp.stack([v2, m2, d2], axis=0)                      # (3, B, T)

    labels2 = labels.reshape(-1, 1).astype(jnp.float32)
    is_train2 = is_train.reshape(-1, 1).astype(jnp.float32)
    lab_train = jnp.concatenate([labels2, is_train2], axis=1)   # (B, 2)

    # f32 slab of all (1, .) parameter rows / scalars: one (8, 4H) tile.
    w_ih_t = params["W_ih"].T                                   # (2, 4H)
    rows = jnp.zeros((8, GN), jnp.float32)
    rows = rows.at[0, :H].set(params["W_td"][:, 0])             # W_td.T row
    rows = rows.at[1, :H].set(params["b_td"])
    rows = rows.at[2, :].set(w_ih_t[0])                         # x_c input row
    rows = rows.at[3, :].set(w_ih_t[1])                         # mask input row
    rows = rows.at[4, :].set(params["b_ih"] + params["b_hh"])
    rows = rows.at[5, :H].set(params["W_out"][0])
    rows = rows.at[6, 0].set(params["b_reg"][0])
    rows = rows.at[6, 1].set(params["b_out"][0])

    # bf16 extended hidden weight: columns [0:4H] = W_hh.T, column 4H = W_reg,
    # rest zero (padded to a 128-lane boundary so x_h lands tile-aligned).
    ext_n = GN + 128
    w_ext = jnp.zeros((H, ext_n), jnp.float32)
    w_ext = w_ext.at[:, :GN].set(params["W_hh"].T)
    w_ext = w_ext.at[:, GN].set(params["W_reg"][0])
    w_ext = w_ext.astype(jnp.bfloat16)

    kernel = functools.partial(_rits_kernel, seq_len=T, hid=H,
                               impute_weight=float(impute_weight),
                               label_weight=float(label_weight))

    vmem = pl.BlockSpec(memory_space=pltpu.MemorySpace.VMEM)
    smem = pl.BlockSpec(memory_space=pltpu.MemorySpace.SMEM)
    loss, pred, imp = pl.pallas_call(
        kernel,
        out_shape=(
            jax.ShapeDtypeStruct((1,), jnp.float32),       # scalar loss (SMEM)
            jax.ShapeDtypeStruct((B, 1), jnp.float32),     # predictions
            jax.ShapeDtypeStruct((B, T), jnp.float32),     # imputations
        ),
        in_specs=[vmem, vmem, vmem, vmem],
        out_specs=(smem, vmem, vmem),
    )(seqs, lab_train, rows, w_ext)

    return {
        "loss": loss[0],
        "predictions": pred,
        "imputations": imp[:, :, None],   # (B, T, 1) like torch.cat of unsqueezed
        "labels": labels2,
        "is_train": is_train2,
        "evals": evals,
        "eval_masks": eval_masks,
    }


# -------------------------- pure-JAX reference -------------------------------
def rits_i_reference(values, masks, deltas, labels, is_train, params,
                     impute_weight, label_weight):
    B, T, _ = values.shape
    H = params["W_td"].shape[0]
    labels2 = labels.reshape(-1, 1).astype(jnp.float32)
    is_train2 = is_train.reshape(-1, 1).astype(jnp.float32)

    h = jnp.zeros((B, H), jnp.float32)
    c = jnp.zeros((B, H), jnp.float32)
    x_loss = 0.0
    imps = []
    for t in range(T):
        x = values[:, t, :]
        m = masks[:, t, :]
        d = deltas[:, t, :]
        gamma = jnp.exp(-jax.nn.relu(d @ params["W_td"].T + params["b_td"]))
        h = h * gamma
        x_h = h @ params["W_reg"].T + params["b_reg"]
        x_c = m * x + (1 - m) * x_h
        x_loss = x_loss + jnp.sum(jnp.abs(x - x_h) * m) / (jnp.sum(m) + 1e-5)
        inputs = jnp.concatenate([x_c, m], axis=1)
        gates = (inputs @ params["W_ih"].T + params["b_ih"]
                 + h @ params["W_hh"].T + params["b_hh"])
        i_g = jax.nn.sigmoid(gates[:, 0 * H:1 * H])
        f_g = jax.nn.sigmoid(gates[:, 1 * H:2 * H])
        g_g = jnp.tanh(gates[:, 2 * H:3 * H])
        o_g = jax.nn.sigmoid(gates[:, 3 * H:4 * H])
        c = f_g * c + i_g * g_g
        h = o_g * jnp.tanh(c)
        imps.append(x_c[:, None, :])
    imputations = jnp.concatenate(imps, axis=1)
    y_logit = h @ params["W_out"].T + params["b_out"]
    max_val = jnp.maximum(-y_logit, 0.0)
    bce = (y_logit - y_logit * labels2 + max_val
           + jnp.log(jnp.exp(-max_val) + jnp.exp(-y_logit - max_val)))
    y_loss = jnp.sum(bce * is_train2) / (jnp.sum(is_train2) + 1e-5)
    return {"loss": x_loss * impute_weight + y_loss * label_weight,
            "predictions": jax.nn.sigmoid(y_logit),
            "imputations": imputations}


# -------------------------------- main ---------------------------------------
def _init_params(key, H):
    ks = jax.random.split(key, 10)
    stdv = 1.0 / math.sqrt(H)
    u = lambda k, shp, s: jax.random.uniform(k, shp, jnp.float32, -s, s)
    return {
        # TemporalDecay(input_size=1, rnn_hid_size=H)
        "W_td": u(ks[0], (H, 1), stdv), "b_td": u(ks[1], (H,), stdv),
        # nn.Linear(H, 1)  (regression)
        "W_reg": u(ks[2], (1, H), stdv), "b_reg": u(ks[3], (1,), stdv),
        # nn.LSTMCell(2, H)
        "W_ih": u(ks[4], (4 * H, 2), stdv), "W_hh": u(ks[5], (4 * H, H), stdv),
        "b_ih": u(ks[6], (4 * H,), stdv), "b_hh": u(ks[7], (4 * H,), stdv),
        # nn.Linear(H, 1)  (out)
        "W_out": u(ks[8], (1, H), stdv), "b_out": u(ks[9], (1,), stdv),
    }


if __name__ == "__main__":
    B, T, H = 8, 8, 32
    impute_weight, label_weight = 0.3, 1.0

    key = jax.random.PRNGKey(0)
    kp, kv, km, kd, kl, kt, ke, kem = jax.random.split(key, 8)

    params = _init_params(kp, H)
    values = jax.random.normal(kv, (B, T, 1), jnp.float32)
    masks = (jax.random.uniform(km, (B, T, 1)) > 0.3).astype(jnp.float32)
    deltas = jax.random.uniform(kd, (B, T, 1), jnp.float32, 0.0, 3.0)
    evals = jax.random.normal(ke, (B, T, 1), jnp.float32)
    eval_masks = (jax.random.uniform(kem, (B, T, 1)) > 0.7).astype(jnp.float32)
    labels = (jax.random.uniform(kl, (B,)) > 0.5).astype(jnp.float32)
    is_train = (jax.random.uniform(kt, (B,)) > 0.2).astype(jnp.float32)

    out = rits_i_forward(values, masks, deltas, evals, eval_masks,
                         labels, is_train, params, impute_weight, label_weight)
    jax.block_until_ready(out)

    ref = rits_i_reference(values, masks, deltas, labels, is_train, params,
                           impute_weight, label_weight)
    assert np.allclose(np.asarray(out["loss"]), np.asarray(ref["loss"]),
                       rtol=1e-2, atol=1e-2)
    assert np.allclose(np.asarray(out["predictions"]),
                       np.asarray(ref["predictions"]), rtol=1e-2, atol=1e-2)
    assert np.allclose(np.asarray(out["imputations"]),
                       np.asarray(ref["imputations"]), rtol=1e-2, atol=1e-2)

    print("KERNEL_OK")
</pallas_src>

<mosaic_0001>
module attributes {stable_mosaic.version = 11 : i64} {
  func.func @_rits_kernel(%arg0: memref<3x8x8xf32, #tpu.memory_space<vmem>>, %arg1: memref<8x2xf32, #tpu.memory_space<vmem>>, %arg2: memref<8x128xf32, #tpu.memory_space<vmem>>, %arg3: memref<32x256xbf16, #tpu.memory_space<vmem>>, %arg4: memref<1xf32, #tpu.memory_space<smem>>, %arg5: memref<8x1xf32, #tpu.memory_space<vmem>>, %arg6: memref<8x8xf32, #tpu.memory_space<vmem>>) attributes {dimension_semantics = [], scalar_prefetch = 0 : i64, scratch_operands = 0 : i64, tpu.core_type = #tpu.core_type<tc>} {
    %c0 = arith.constant 0 : index
    %c0_0 = arith.constant 0 : index
    %c0_1 = arith.constant 0 : index
    %0 = vector.load %arg0[%c0, %c0_0, %c0_1] : memref<3x8x8xf32, #tpu.memory_space<vmem>>, vector<1x8x8xf32>
    %1 = vector.shape_cast %0 : vector<1x8x8xf32> to vector<8x8xf32>
    %c1 = arith.constant 1 : index
    %c0_2 = arith.constant 0 : index
    %c0_3 = arith.constant 0 : index
    %2 = vector.load %arg0[%c1, %c0_2, %c0_3] : memref<3x8x8xf32, #tpu.memory_space<vmem>>, vector<1x8x8xf32>
    %3 = vector.shape_cast %2 : vector<1x8x8xf32> to vector<8x8xf32>
    %c2 = arith.constant 2 : index
    %c0_4 = arith.constant 0 : index
    %c0_5 = arith.constant 0 : index
    %4 = vector.load %arg0[%c2, %c0_4, %c0_5] : memref<3x8x8xf32, #tpu.memory_space<vmem>>, vector<1x8x8xf32>
    %5 = vector.shape_cast %4 : vector<1x8x8xf32> to vector<8x8xf32>
    %c0_6 = arith.constant 0 : index
    %c0_7 = arith.constant 0 : index
    %6 = vector.load %arg2[%c0_6, %c0_7] : memref<8x128xf32, #tpu.memory_space<vmem>>, vector<8x128xf32>
    %7 = vector.extract_strided_slice %6 {offsets = [0, 0], sizes = [1, 32], strides = [1, 1]} : vector<8x128xf32> to vector<1x32xf32>
    %8 = vector.extract_strided_slice %6 {offsets = [1, 0], sizes = [1, 32], strides = [1, 1]} : vector<8x128xf32> to vector<1x32xf32>
    %9 = vector.extract_strided_slice %6 {offsets = [2, 0], sizes = [1, 128], strides = [1, 1]} : vector<8x128xf32> to vector<1x128xf32>
    %10 = vector.extract_strided_slice %6 {offsets = [3, 0], sizes = [1, 128], strides = [1, 1]} : vector<8x128xf32> to vector<1x128xf32>
    %11 = vector.extract_strided_slice %6 {offsets = [4, 0], sizes = [1, 128], strides = [1, 1]} : vector<8x128xf32> to vector<1x128xf32>
    %12 = vector.extract_strided_slice %6 {offsets = [5, 0], sizes = [1, 32], strides = [1, 1]} : vector<8x128xf32> to vector<1x32xf32>
    %13 = vector.extract_strided_slice %6 {offsets = [6, 0], sizes = [1, 1], strides = [1, 1]} : vector<8x128xf32> to vector<1x1xf32>
    %14 = vector.extract_strided_slice %6 {offsets = [6, 1], sizes = [1, 1], strides = [1, 1]} : vector<8x128xf32> to vector<1x1xf32>
    %c0_8 = arith.constant 0 : index
    %c0_9 = arith.constant 0 : index
    %15 = vector.load %arg3[%c0_8, %c0_9] : memref<32x256xbf16, #tpu.memory_space<vmem>>, vector<32x256xbf16>
    %16 = vector.extract_strided_slice %5 {offsets = [0, 0], sizes = [8, 1], strides = [1, 1]} : vector<8x8xf32> to vector<8x1xf32>
    %17 = vector.broadcast %16 : vector<8x1xf32> to vector<8x32xf32>
    %18 = vector.broadcast %7 : vector<1x32xf32> to vector<8x32xf32>
    %19 = arith.mulf %17, %18 : vector<8x32xf32>
    %20 = vector.broadcast %8 : vector<1x32xf32> to vector<8x32xf32>
    %21 = arith.addf %19, %20 : vector<8x32xf32>
    %cst = arith.constant 0.000000e+00 : f32
    %22 = vector.broadcast %cst : f32 to vector<8x32xf32>
    %23 = arith.maximumf %21, %22 : vector<8x32xf32>
    %cst_10 = arith.constant 0.000000e+00 : f32
    %24 = vector.broadcast %cst_10 : f32 to vector<8x32xf32>
    %25 = arith.subf %24, %23 : vector<8x32xf32>
    %26 = math.exp %25 : vector<8x32xf32>
    %27 = vector.extract_strided_slice %5 {offsets = [0, 1], sizes = [8, 1], strides = [1, 1]} : vector<8x8xf32> to vector<8x1xf32>
    %28 = vector.broadcast %27 : vector<8x1xf32> to vector<8x32xf32>
    %29 = vector.broadcast %7 : vector<1x32xf32> to vector<8x32xf32>
    %30 = arith.mulf %28, %29 : vector<8x32xf32>
    %31 = vector.broadcast %8 : vector<1x32xf32> to vector<8x32xf32>
    %32 = arith.addf %30, %31 : vector<8x32xf32>
    %cst_11 = arith.constant 0.000000e+00 : f32
    %33 = vector.broadcast %cst_11 : f32 to vector<8x32xf32>
    %34 = arith.maximumf %32, %33 : vector<8x32xf32>
    %cst_12 = arith.constant 0.000000e+00 : f32
    %35 = vector.broadcast %cst_12 : f32 to vector<8x32xf32>
    %36 = arith.subf %35, %34 : vector<8x32xf32>
    %37 = math.exp %36 : vector<8x32xf32>
    %38 = vector.extract_strided_slice %5 {offsets = [0, 2], sizes = [8, 1], strides = [1, 1]} : vector<8x8xf32> to vector<8x1xf32>
    %39 = vector.broadcast %38 : vector<8x1xf32> to vector<8x32xf32>
    %40 = vector.broadcast %7 : vector<1x32xf32> to vector<8x32xf32>
    %41 = arith.mulf %39, %40 : vector<8x32xf32>
    %42 = vector.broadcast %8 : vector<1x32xf32> to vector<8x32xf32>
    %43 = arith.addf %41, %42 : vector<8x32xf32>
    %cst_13 = arith.constant 0.000000e+00 : f32
    %44 = vector.broadcast %cst_13 : f32 to vector<8x32xf32>
    %45 = arith.maximumf %43, %44 : vector<8x32xf32>
    %cst_14 = arith.constant 0.000000e+00 : f32
    %46 = vector.broadcast %cst_14 : f32 to vector<8x32xf32>
    %47 = arith.subf %46, %45 : vector<8x32xf32>
    %48 = math.exp %47 : vector<8x32xf32>
    %49 = vector.extract_strided_slice %5 {offsets = [0, 3], sizes = [8, 1], strides = [1, 1]} : vector<8x8xf32> to vector<8x1xf32>
    %50 = vector.broadcast %49 : vector<8x1xf32> to vector<8x32xf32>
    %51 = vector.broadcast %7 : vector<1x32xf32> to vector<8x32xf32>
    %52 = arith.mulf %50, %51 : vector<8x32xf32>
    %53 = vector.broadcast %8 : vector<1x32xf32> to vector<8x32xf32>
    %54 = arith.addf %52, %53 : vector<8x32xf32>
    %cst_15 = arith.constant 0.000000e+00 : f32
    %55 = vector.broadcast %cst_15 : f32 to vector<8x32xf32>
    %56 = arith.maximumf %54, %55 : vector<8x32xf32>
    %cst_16 = arith.constant 0.000000e+00 : f32
    %57 = vector.broadcast %cst_16 : f32 to vector<8x32xf32>
    %58 = arith.subf %57, %56 : vector<8x32xf32>
    %59 = math.exp %58 : vector<8x32xf32>
    %60 = vector.extract_strided_slice %5 {offsets = [0, 4], sizes = [8, 1], strides = [1, 1]} : vector<8x8xf32> to vector<8x1xf32>
    %61 = vector.broadcast %60 : vector<8x1xf32> to vector<8x32xf32>
    %62 = vector.broadcast %7 : vector<1x32xf32> to vector<8x32xf32>
    %63 = arith.mulf %61, %62 : vector<8x32xf32>
    %64 = vector.broadcast %8 : vector<1x32xf32> to vector<8x32xf32>
    %65 = arith.addf %63, %64 : vector<8x32xf32>
    %cst_17 = arith.constant 0.000000e+00 : f32
    %66 = vector.broadcast %cst_17 : f32 to vector<8x32xf32>
    %67 = arith.maximumf %65, %66 : vector<8x32xf32>
    %cst_18 = arith.constant 0.000000e+00 : f32
    %68 = vector.broadcast %cst_18 : f32 to vector<8x32xf32>
    %69 = arith.subf %68, %67 : vector<8x32xf32>
    %70 = math.exp %69 : vector<8x32xf32>
    %71 = vector.extract_strided_slice %5 {offsets = [0, 5], sizes = [8, 1], strides = [1, 1]} : vector<8x8xf32> to vector<8x1xf32>
    %72 = vector.broadcast %71 : vector<8x1xf32> to vector<8x32xf32>
    %73 = vector.broadcast %7 : vector<1x32xf32> to vector<8x32xf32>
    %74 = arith.mulf %72, %73 : vector<8x32xf32>
    %75 = vector.broadcast %8 : vector<1x32xf32> to vector<8x32xf32>
    %76 = arith.addf %74, %75 : vector<8x32xf32>
    %cst_19 = arith.constant 0.000000e+00 : f32
    %77 = vector.broadcast %cst_19 : f32 to vector<8x32xf32>
    %78 = arith.maximumf %76, %77 : vector<8x32xf32>
    %cst_20 = arith.constant 0.000000e+00 : f32
    %79 = vector.broadcast %cst_20 : f32 to vector<8x32xf32>
    %80 = arith.subf %79, %78 : vector<8x32xf32>
    %81 = math.exp %80 : vector<8x32xf32>
    %82 = vector.extract_strided_slice %5 {offsets = [0, 6], sizes = [8, 1], strides = [1, 1]} : vector<8x8xf32> to vector<8x1xf32>
    %83 = vector.broadcast %82 : vector<8x1xf32> to vector<8x32xf32>
    %84 = vector.broadcast %7 : vector<1x32xf32> to vector<8x32xf32>
    %85 = arith.mulf %83, %84 : vector<8x32xf32>
    %86 = vector.broadcast %8 : vector<1x32xf32> to vector<8x32xf32>
    %87 = arith.addf %85, %86 : vector<8x32xf32>
    %cst_21 = arith.constant 0.000000e+00 : f32
    %88 = vector.broadcast %cst_21 : f32 to vector<8x32xf32>
    %89 = arith.maximumf %87, %88 : vector<8x32xf32>
    %cst_22 = arith.constant 0.000000e+00 : f32
    %90 = vector.broadcast %cst_22 : f32 to vector<8x32xf32>
    %91 = arith.subf %90, %89 : vector<8x32xf32>
    %92 = math.exp %91 : vector<8x32xf32>
    %93 = vector.extract_strided_slice %5 {offsets = [0, 7], sizes = [8, 1], strides = [1, 1]} : vector<8x8xf32> to vector<8x1xf32>
    %94 = vector.broadcast %93 : vector<8x1xf32> to vector<8x32xf32>
    %95 = vector.broadcast %7 : vector<1x32xf32> to vector<8x32xf32>
    %96 = arith.mulf %94, %95 : vector<8x32xf32>
    %97 = vector.broadcast %8 : vector<1x32xf32> to vector<8x32xf32>
    %98 = arith.addf %96, %97 : vector<8x32xf32>
    %cst_23 = arith.constant 0.000000e+00 : f32
    %99 = vector.broadcast %cst_23 : f32 to vector<8x32xf32>
    %100 = arith.maximumf %98, %99 : vector<8x32xf32>
    %cst_24 = arith.constant 0.000000e+00 : f32
    %101 = vector.broadcast %cst_24 : f32 to vector<8x32xf32>
    %102 = arith.subf %101, %100 : vector<8x32xf32>
    %103 = math.exp %102 : vector<8x32xf32>
    %cst_25 = arith.constant dense<0.000000e+00> : vector<8xf32>
    %104 = vector.multi_reduction <add>, %3, %cst_25 [0] : vector<8x8xf32> to vector<8xf32>
    %105 = vector.shape_cast %104 : vector<8xf32> to vector<1x8xf32>
    %cst_26 = arith.constant 9.99999974E-6 : f32
    %106 = vector.broadcast %cst_26 : f32 to vector<1x8xf32>
    %107 = arith.addf %105, %106 : vector<1x8xf32>
    %cst_27 = arith.constant 1.000000e+00 : f32
    %108 = vector.broadcast %cst_27 : f32 to vector<1x8xf32>
    %109 = arith.divf %108, %107 : vector<1x8xf32>
    %110 = vector.broadcast %109 : vector<1x8xf32> to vector<8x8xf32>
    %111 = arith.mulf %3, %110 : vector<8x8xf32>
    %112 = vector.extract_strided_slice %1 {offsets = [0, 0], sizes = [8, 1], strides = [1, 1]} : vector<8x8xf32> to vector<8x1xf32>
    %113 = vector.extract_strided_slice %1 {offsets = [0, 1], sizes = [8, 1], strides = [1, 1]} : vector<8x8xf32> to vector<8x1xf32>
    %114 = vector.extract_strided_slice %1 {offsets = [0, 2], sizes = [8, 1], strides = [1, 1]} : vector<8x8xf32> to vector<8x1xf32>
    %115 = vector.extract_strided_slice %1 {offsets = [0, 3], sizes = [8, 1], strides = [1, 1]} : vector<8x8xf32> to vector<8x1xf32>
    %116 = vector.extract_strided_slice %1 {offsets = [0, 4], sizes = [8, 1], strides = [1, 1]} : vector<8x8xf32> to vector<8x1xf32>
    %117 = vector.extract_strided_slice %1 {offsets = [0, 5], sizes = [8, 1], strides = [1, 1]} : vector<8x8xf32> to vector<8x1xf32>
    %118 = vector.extract_strided_slice %1 {offsets = [0, 6], sizes = [8, 1], strides = [1, 1]} : vector<8x8xf32> to vector<8x1xf32>
    %119 = vector.extract_strided_slice %1 {offsets = [0, 7], sizes = [8, 1], strides = [1, 1]} : vector<8x8xf32> to vector<8x1xf32>
    %120 = vector.extract_strided_slice %3 {offsets = [0, 0], sizes = [8, 1], strides = [1, 1]} : vector<8x8xf32> to vector<8x1xf32>
    %121 = vector.extract_strided_slice %3 {offsets = [0, 1], sizes = [8, 1], strides = [1, 1]} : vector<8x8xf32> to vector<8x1xf32>
    %122 = vector.extract_strided_slice %3 {offsets = [0, 2], sizes = [8, 1], strides = [1, 1]} : vector<8x8xf32> to vector<8x1xf32>
    %123 = vector.extract_strided_slice %3 {offsets = [0, 3], sizes = [8, 1], strides = [1, 1]} : vector<8x8xf32> to vector<8x1xf32>
    %124 = vector.extract_strided_slice %3 {offsets = [0, 4], sizes = [8, 1], strides = [1, 1]} : vector<8x8xf32> to vector<8x1xf32>
    %125 = vector.extract_strided_slice %3 {offsets = [0, 5], sizes = [8, 1], strides = [1, 1]} : vector<8x8xf32> to vector<8x1xf32>
    %126 = vector.extract_strided_slice %3 {offsets = [0, 6], sizes = [8, 1], strides = [1, 1]} : vector<8x8xf32> to vector<8x1xf32>
    %127 = vector.extract_strided_slice %3 {offsets = [0, 7], sizes = [8, 1], strides = [1, 1]} : vector<8x8xf32> to vector<8x1xf32>
    %128 = vector.extract_strided_slice %111 {offsets = [0, 0], sizes = [8, 1], strides = [1, 1]} : vector<8x8xf32> to vector<8x1xf32>
    %129 = vector.extract_strided_slice %111 {offsets = [0, 1], sizes = [8, 1], strides = [1, 1]} : vector<8x8xf32> to vector<8x1xf32>
    %130 = vector.extract_strided_slice %111 {offsets = [0, 2], sizes = [8, 1], strides = [1, 1]} : vector<8x8xf32> to vector<8x1xf32>
    %131 = vector.extract_strided_slice %111 {offsets = [0, 3], sizes = [8, 1], strides = [1, 1]} : vector<8x8xf32> to vector<8x1xf32>
    %132 = vector.extract_strided_slice %111 {offsets = [0, 4], sizes = [8, 1], strides = [1, 1]} : vector<8x8xf32> to vector<8x1xf32>
    %133 = vector.extract_strided_slice %111 {offsets = [0, 5], sizes = [8, 1], strides = [1, 1]} : vector<8x8xf32> to vector<8x1xf32>
    %134 = vector.extract_strided_slice %111 {offsets = [0, 6], sizes = [8, 1], strides = [1, 1]} : vector<8x8xf32> to vector<8x1xf32>
    %135 = vector.extract_strided_slice %111 {offsets = [0, 7], sizes = [8, 1], strides = [1, 1]} : vector<8x8xf32> to vector<8x1xf32>
    %cst_28 = arith.constant 0.000000e+00 : f32
    %136 = vector.broadcast %cst_28 : f32 to vector<8x32xf32>
    %cst_29 = arith.constant 0.000000e+00 : f32
    %137 = vector.broadcast %cst_29 : f32 to vector<8x32xf32>
    %cst_30 = arith.constant 0.000000e+00 : f32
    %138 = vector.broadcast %cst_30 : f32 to vector<8x1xf32>
    %139 = arith.mulf %136, %26 : vector<8x32xf32>
    %140 = arith.truncf %139 : vector<8x32xf32> to vector<8x32xbf16>
    %cst_31 = arith.constant dense<0.000000e+00> : vector<8x256xf32>
    %141 = tpu.matmul %140, %15, %cst_31 {dimension_numbers = #tpu.dot_dimension_numbers<[1], [0], [0], [1], [0, 0, 1, 1], [], []>} : vector<8x32xbf16>, vector<32x256xbf16>, vector<8x256xf32> -> vector<8x256xf32>
    %142 = vector.extract_strided_slice %141 {offsets = [0, 128], sizes = [8, 1], strides = [1, 1]} : vector<8x256xf32> to vector<8x1xf32>
    %143 = vector.broadcast %13 : vector<1x1xf32> to vector<8x1xf32>
    %144 = arith.addf %142, %143 : vector<8x1xf32>
    %145 = arith.mulf %120, %112 : vector<8x1xf32>
    %cst_32 = arith.constant 1.000000e+00 : f32
    %146 = vector.broadcast %cst_32 : f32 to vector<8x1xf32>
    %147 = arith.subf %146, %120 : vector<8x1xf32>
    %148 = arith.mulf %147, %144 : vector<8x1xf32>
    %149 = arith.addf %145, %148 : vector<8x1xf32>
    %150 = arith.subf %112, %144 : vector<8x1xf32>
    %151 = math.absf %150 : vector<8x1xf32>
    %152 = arith.mulf %151, %128 : vector<8x1xf32>
    %153 = arith.addf %138, %152 : vector<8x1xf32>
    %c0_33 = arith.constant 0 : index
    %c0_34 = arith.constant 0 : index
    %154 = vector.load %arg6[%c0_33, %c0_34] : memref<8x8xf32, #tpu.memory_space<vmem>>, vector<8x1xf32>
    tpu.vector_store %arg6[%c0_33, %c0_34], %149 {strides = array<i32>} : memref<8x8xf32, #tpu.memory_space<vmem>>, vector<8x1xf32>,
    %155 = vector.extract_strided_slice %141 {offsets = [0, 0], sizes = [8, 128], strides = [1, 1]} : vector<8x256xf32> to vector<8x128xf32>
    %156 = vector.broadcast %149 : vector<8x1xf32> to vector<8x128xf32>
    %157 = vector.broadcast %9 : vector<1x128xf32> to vector<8x128xf32>
    %158 = arith.mulf %156, %157 : vector<8x128xf32>
    %159 = arith.addf %155, %158 : vector<8x128xf32>
    %160 = vector.broadcast %120 : vector<8x1xf32> to vector<8x128xf32>
    %161 = vector.broadcast %10 : vector<1x128xf32> to vector<8x128xf32>
    %162 = arith.mulf %160, %161 : vector<8x128xf32>
    %163 = arith.addf %159, %162 : vector<8x128xf32>
    %164 = vector.broadcast %11 : vector<1x128xf32> to vector<8x128xf32>
    %165 = arith.addf %163, %164 : vector<8x128xf32>
    %166 = arith.negf %165 : vector<8x128xf32>
    %167 = math.exp %166 : vector<8x128xf32>
    %cst_35 = arith.constant 1.000000e+00 : f32
    %168 = vector.broadcast %cst_35 : f32 to vector<8x128xf32>
    %169 = arith.addf %168, %167 : vector<8x128xf32>
    %170 = arith.divf %168, %169 : vector<8x128xf32>
    %171 = vector.extract_strided_slice %170 {offsets = [0, 0], sizes = [8, 32], strides = [1, 1]} : vector<8x128xf32> to vector<8x32xf32>
    %172 = vector.extract_strided_slice %170 {offsets = [0, 32], sizes = [8, 32], strides = [1, 1]} : vector<8x128xf32> to vector<8x32xf32>
    %173 = vector.extract_strided_slice %170 {offsets = [0, 96], sizes = [8, 32], strides = [1, 1]} : vector<8x128xf32> to vector<8x32xf32>
    %174 = vector.extract_strided_slice %165 {offsets = [0, 64], sizes = [8, 32], strides = [1, 1]} : vector<8x128xf32> to vector<8x32xf32>
    %175 = math.tanh %174 : vector<8x32xf32>
    %176 = arith.mulf %172, %137 : vector<8x32xf32>
    %177 = arith.mulf %171, %175 : vector<8x32xf32>
    %178 = arith.addf %176, %177 : vector<8x32xf32>
    %179 = math.tanh %178 : vector<8x32xf32>
    %180 = arith.mulf %173, %179 : vector<8x32xf32>
    %181 = arith.mulf %180, %37 : vector<8x32xf32>
    %182 = arith.truncf %181 : vector<8x32xf32> to vector<8x32xbf16>
    %cst_36 = arith.constant dense<0.000000e+00> : vector<8x256xf32>
    %183 = tpu.matmul %182, %15, %cst_36 {dimension_numbers = #tpu.dot_dimension_numbers<[1], [0], [0], [1], [0, 0, 1, 1], [], []>} : vector<8x32xbf16>, vector<32x256xbf16>, vector<8x256xf32> -> vector<8x256xf32>
    %184 = vector.extract_strided_slice %183 {offsets = [0, 128], sizes = [8, 1], strides = [1, 1]} : vector<8x256xf32> to vector<8x1xf32>
    %185 = vector.broadcast %13 : vector<1x1xf32> to vector<8x1xf32>
    %186 = arith.addf %184, %185 : vector<8x1xf32>
    %187 = arith.mulf %121, %113 : vector<8x1xf32>
    %cst_37 = arith.constant 1.000000e+00 : f32
    %188 = vector.broadcast %cst_37 : f32 to vector<8x1xf32>
    %189 = arith.subf %188, %121 : vector<8x1xf32>
    %190 = arith.mulf %189, %186 : vector<8x1xf32>
    %191 = arith.addf %187, %190 : vector<8x1xf32>
    %192 = arith.subf %113, %186 : vector<8x1xf32>
    %193 = math.absf %192 : vector<8x1xf32>
    %194 = arith.mulf %193, %129 : vector<8x1xf32>
    %195 = arith.addf %153, %194 : vector<8x1xf32>
    %c0_38 = arith.constant 0 : index
    %c1_39 = arith.constant 1 : index
    %196 = vector.load %arg6[%c0_38, %c1_39] : memref<8x8xf32, #tpu.memory_space<vmem>>, vector<8x1xf32>
    tpu.vector_store %arg6[%c0_38, %c1_39], %191 {strides = array<i32>} : memref<8x8xf32, #tpu.memory_space<vmem>>, vector<8x1xf32>,
    %197 = vector.extract_strided_slice %183 {offsets = [0, 0], sizes = [8, 128], strides = [1, 1]} : vector<8x256xf32> to vector<8x128xf32>
    %198 = vector.broadcast %191 : vector<8x1xf32> to vector<8x128xf32>
    %199 = vector.broadcast %9 : vector<1x128xf32> to vector<8x128xf32>
    %200 = arith.mulf %198, %199 : vector<8x128xf32>
    %201 = arith.addf %197, %200 : vector<8x128xf32>
    %202 = vector.broadcast %121 : vector<8x1xf32> to vector<8x128xf32>
    %203 = vector.broadcast %10 : vector<1x128xf32> to vector<8x128xf32>
    %204 = arith.mulf %202, %203 : vector<8x128xf32>
    %205 = arith.addf %201, %204 : vector<8x128xf32>
    %206 = vector.broadcast %11 : vector<1x128xf32> to vector<8x128xf32>
    %207 = arith.addf %205, %206 : vector<8x128xf32>
    %208 = arith.negf %207 : vector<8x128xf32>
    %209 = math.exp %208 : vector<8x128xf32>
    %cst_40 = arith.constant 1.000000e+00 : f32
    %210 = vector.broadcast %cst_40 : f32 to vector<8x128xf32>
    %211 = arith.addf %210, %209 : vector<8x128xf32>
    %212 = arith.divf %210, %211 : vector<8x128xf32>
    %213 = vector.extract_strided_slice %212 {offsets = [0, 0], sizes = [8, 32], strides = [1, 1]} : vector<8x128xf32> to vector<8x32xf32>
    %214 = vector.extract_strided_slice %212 {offsets = [0, 32], sizes = [8, 32], strides = [1, 1]} : vector<8x128xf32> to vector<8x32xf32>
    %215 = vector.extract_strided_slice %212 {offsets = [0, 96], sizes = [8, 32], strides = [1, 1]} : vector<8x128xf32> to vector<8x32xf32>
    %216 = vector.extract_strided_slice %207 {offsets = [0, 64], sizes = [8, 32], strides = [1, 1]} : vector<8x128xf32> to vector<8x32xf32>
    %217 = math.tanh %216 : vector<8x32xf32>
    %218 = arith.mulf %214, %178 : vector<8x32xf32>
    %219 = arith.mulf %213, %217 : vector<8x32xf32>
    %220 = arith.addf %218, %219 : vector<8x32xf32>
    %221 = math.tanh %220 : vector<8x32xf32>
    %222 = arith.mulf %215, %221 : vector<8x32xf32>
    %223 = arith.mulf %222, %48 : vector<8x32xf32>
    %224 = arith.truncf %223 : vector<8x32xf32> to vector<8x32xbf16>
    %cst_41 = arith.constant dense<0.000000e+00> : vector<8x256xf32>
    %225 = tpu.matmul %224, %15, %cst_41 {dimension_numbers = #tpu.dot_dimension_numbers<[1], [0], [0], [1], [0, 0, 1, 1], [], []>} : vector<8x32xbf16>, vector<32x256xbf16>, vector<8x256xf32> -> vector<8x256xf32>
    %226 = vector.extract_strided_slice %225 {offsets = [0, 128], sizes = [8, 1], strides = [1, 1]} : vector<8x256xf32> to vector<8x1xf32>
    %227 = vector.broadcast %13 : vector<1x1xf32> to vector<8x1xf32>
    %228 = arith.addf %226, %227 : vector<8x1xf32>
    %229 = arith.mulf %122, %114 : vector<8x1xf32>
    %cst_42 = arith.constant 1.000000e+00 : f32
    %230 = vector.broadcast %cst_42 : f32 to vector<8x1xf32>
    %231 = arith.subf %230, %122 : vector<8x1xf32>
    %232 = arith.mulf %231, %228 : vector<8x1xf32>
    %233 = arith.addf %229, %232 : vector<8x1xf32>
    %234 = arith.subf %114, %228 : vector<8x1xf32>
    %235 = math.absf %234 : vector<8x1xf32>
    %236 = arith.mulf %235, %130 : vector<8x1xf32>
    %237 = arith.addf %195, %236 : vector<8x1xf32>
    %c0_43 = arith.constant 0 : index
    %c2_44 = arith.constant 2 : index
    %238 = vector.load %arg6[%c0_43, %c2_44] : memref<8x8xf32, #tpu.memory_space<vmem>>, vector<8x1xf32>
    tpu.vector_store %arg6[%c0_43, %c2_44], %233 {strides = array<i32>} : memref<8x8xf32, #tpu.memory_space<vmem>>, vector<8x1xf32>,
    %239 = vector.extract_strided_slice %225 {offsets = [0, 0], sizes = [8, 128], strides = [1, 1]} : vector<8x256xf32> to vector<8x128xf32>
    %240 = vector.broadcast %233 : vector<8x1xf32> to vector<8x128xf32>
    %241 = vector.broadcast %9 : vector<1x128xf32> to vector<8x128xf32>
    %242 = arith.mulf %240, %241 : vector<8x128xf32>
    %243 = arith.addf %239, %242 : vector<8x128xf32>
    %244 = vector.broadcast %122 : vector<8x1xf32> to vector<8x128xf32>
    %245 = vector.broadcast %10 : vector<1x128xf32> to vector<8x128xf32>
    %246 = arith.mulf %244, %245 : vector<8x128xf32>
    %247 = arith.addf %243, %246 : vector<8x128xf32>
    %248 = vector.broadcast %11 : vector<1x128xf32> to vector<8x128xf32>
    %249 = arith.addf %247, %248 : vector<8x128xf32>
    %250 = arith.negf %249 : vector<8x128xf32>
    %251 = math.exp %250 : vector<8x128xf32>
    %cst_45 = arith.constant 1.000000e+00 : f32
    %252 = vector.broadcast %cst_45 : f32 to vector<8x128xf32>
    %253 = arith.addf %252, %251 : vector<8x128xf32>
    %254 = arith.divf %252, %253 : vector<8x128xf32>
    %255 = vector.extract_strided_slice %254 {offsets = [0, 0], sizes = [8, 32], strides = [1, 1]} : vector<8x128xf32> to vector<8x32xf32>
    %256 = vector.extract_strided_slice %254 {offsets = [0, 32], sizes = [8, 32], strides = [1, 1]} : vector<8x128xf32> to vector<8x32xf32>
    %257 = vector.extract_strided_slice %254 {offsets = [0, 96], sizes = [8, 32], strides = [1, 1]} : vector<8x128xf32> to vector<8x32xf32>
    %258 = vector.extract_strided_slice %249 {offsets = [0, 64], sizes = [8, 32], strides = [1, 1]} : vector<8x128xf32> to vector<8x32xf32>
    %259 = math.tanh %258 : vector<8x32xf32>
    %260 = arith.mulf %256, %220 : vector<8x32xf32>
    %261 = arith.mulf %255, %259 : vector<8x32xf32>
    %262 = arith.addf %260, %261 : vector<8x32xf32>
    %263 = math.tanh %262 : vector<8x32xf32>
    %264 = arith.mulf %257, %263 : vector<8x32xf32>
    %265 = arith.mulf %264, %59 : vector<8x32xf32>
    %266 = arith.truncf %265 : vector<8x32xf32> to vector<8x32xbf16>
    %cst_46 = arith.constant dense<0.000000e+00> : vector<8x256xf32>
    %267 = tpu.matmul %266, %15, %cst_46 {dimension_numbers = #tpu.dot_dimension_numbers<[1], [0], [0], [1], [0, 0, 1, 1], [], []>} : vector<8x32xbf16>, vector<32x256xbf16>, vector<8x256xf32> -> vector<8x256xf32>
    %268 = vector.extract_strided_slice %267 {offsets = [0, 128], sizes = [8, 1], strides = [1, 1]} : vector<8x256xf32> to vector<8x1xf32>
    %269 = vector.broadcast %13 : vector<1x1xf32> to vector<8x1xf32>
    %270 = arith.addf %268, %269 : vector<8x1xf32>
    %271 = arith.mulf %123, %115 : vector<8x1xf32>
    %cst_47 = arith.constant 1.000000e+00 : f32
    %272 = vector.broadcast %cst_47 : f32 to vector<8x1xf32>
    %273 = arith.subf %272, %123 : vector<8x1xf32>
    %274 = arith.mulf %273, %270 : vector<8x1xf32>
    %275 = arith.addf %271, %274 : vector<8x1xf32>
    %276 = arith.subf %115, %270 : vector<8x1xf32>
    %277 = math.absf %276 : vector<8x1xf32>
    %278 = arith.mulf %277, %131 : vector<8x1xf32>
    %279 = arith.addf %237, %278 : vector<8x1xf32>
    %c0_48 = arith.constant 0 : index
    %c3 = arith.constant 3 : index
    %280 = vector.load %arg6[%c0_48, %c3] : memref<8x8xf32, #tpu.memory_space<vmem>>, vector<8x1xf32>
    tpu.vector_store %arg6[%c0_48, %c3], %275 {strides = array<i32>} : memref<8x8xf32, #tpu.memory_space<vmem>>, vector<8x1xf32>,
    %281 = vector.extract_strided_slice %267 {offsets = [0, 0], sizes = [8, 128], strides = [1, 1]} : vector<8x256xf32> to vector<8x128xf32>
    %282 = vector.broadcast %275 : vector<8x1xf32> to vector<8x128xf32>
    %283 = vector.broadcast %9 : vector<1x128xf32> to vector<8x128xf32>
    %284 = arith.mulf %282, %283 : vector<8x128xf32>
    %285 = arith.addf %281, %284 : vector<8x128xf32>
    %286 = vector.broadcast %123 : vector<8x1xf32> to vector<8x128xf32>
    %287 = vector.broadcast %10 : vector<1x128xf32> to vector<8x128xf32>
    %288 = arith.mulf %286, %287 : vector<8x128xf32>
    %289 = arith.addf %285, %288 : vector<8x128xf32>
    %290 = vector.broadcast %11 : vector<1x128xf32> to vector<8x128xf32>
    %291 = arith.addf %289, %290 : vector<8x128xf32>
    %292 = arith.negf %291 : vector<8x128xf32>
    %293 = math.exp %292 : vector<8x128xf32>
    %cst_49 = arith.constant 1.000000e+00 : f32
    %294 = vector.broadcast %cst_49 : f32 to vector<8x128xf32>
    %295 = arith.addf %294, %293 : vector<8x128xf32>
    %296 = arith.divf %294, %295 : vector<8x128xf32>
    %297 = vector.extract_strided_slice %296 {offsets = [0, 0], sizes = [8, 32], strides = [1, 1]} : vector<8x128xf32> to vector<8x32xf32>
    %298 = vector.extract_strided_slice %296 {offsets = [0, 32], sizes = [8, 32], strides = [1, 1]} : vector<8x128xf32> to vector<8x32xf32>
    %299 = vector.extract_strided_slice %296 {offsets = [0, 96], sizes = [8, 32], strides = [1, 1]} : vector<8x128xf32> to vector<8x32xf32>
    %300 = vector.extract_strided_slice %291 {offsets = [0, 64], sizes = [8, 32], strides = [1, 1]} : vector<8x128xf32> to vector<8x32xf32>
    %301 = math.tanh %300 : vector<8x32xf32>
    %302 = arith.mulf %298, %262 : vector<8x32xf32>
    %303 = arith.mulf %297, %301 : vector<8x32xf32>
    %304 = arith.addf %302, %303 : vector<8x32xf32>
    %305 = math.tanh %304 : vector<8x32xf32>
    %306 = arith.mulf %299, %305 : vector<8x32xf32>
    %307 = arith.mulf %306, %70 : vector<8x32xf32>
    %308 = arith.truncf %307 : vector<8x32xf32> to vector<8x32xbf16>
    %cst_50 = arith.constant dense<0.000000e+00> : vector<8x256xf32>
    %309 = tpu.matmul %308, %15, %cst_50 {dimension_numbers = #tpu.dot_dimension_numbers<[1], [0], [0], [1], [0, 0, 1, 1], [], []>} : vector<8x32xbf16>, vector<32x256xbf16>, vector<8x256xf32> -> vector<8x256xf32>
    %310 = vector.extract_strided_slice %309 {offsets = [0, 128], sizes = [8, 1], strides = [1, 1]} : vector<8x256xf32> to vector<8x1xf32>
    %311 = vector.broadcast %13 : vector<1x1xf32> to vector<8x1xf32>
    %312 = arith.addf %310, %311 : vector<8x1xf32>
    %313 = arith.mulf %124, %116 : vector<8x1xf32>
    %cst_51 = arith.constant 1.000000e+00 : f32
    %314 = vector.broadcast %cst_51 : f32 to vector<8x1xf32>
    %315 = arith.subf %314, %124 : vector<8x1xf32>
    %316 = arith.mulf %315, %312 : vector<8x1xf32>
    %317 = arith.addf %313, %316 : vector<8x1xf32>
    %318 = arith.subf %116, %312 : vector<8x1xf32>
    %319 = math.absf %318 : vector<8x1xf32>
    %320 = arith.mulf %319, %132 : vector<8x1xf32>
    %321 = arith.addf %279, %320 : vector<8x1xf32>
    %c0_52 = arith.constant 0 : index
    %c4 = arith.constant 4 : index
    %322 = vector.load %arg6[%c0_52, %c4] : memref<8x8xf32, #tpu.memory_space<vmem>>, vector<8x1xf32>
    tpu.vector_store %arg6[%c0_52, %c4], %317 {strides = array<i32>} : memref<8x8xf32, #tpu.memory_space<vmem>>, vector<8x1xf32>,
    %323 = vector.extract_strided_slice %309 {offsets = [0, 0], sizes = [8, 128], strides = [1, 1]} : vector<8x256xf32> to vector<8x128xf32>
    %324 = vector.broadcast %317 : vector<8x1xf32> to vector<8x128xf32>
    %325 = vector.broadcast %9 : vector<1x128xf32> to vector<8x128xf32>
    %326 = arith.mulf %324, %325 : vector<8x128xf32>
    %327 = arith.addf %323, %326 : vector<8x128xf32>
    %328 = vector.broadcast %124 : vector<8x1xf32> to vector<8x128xf32>
    %329 = vector.broadcast %10 : vector<1x128xf32> to vector<8x128xf32>
    %330 = arith.mulf %328, %329 : vector<8x128xf32>
    %331 = arith.addf %327, %330 : vector<8x128xf32>
    %332 = vector.broadcast %11 : vector<1x128xf32> to vector<8x128xf32>
    %333 = arith.addf %331, %332 : vector<8x128xf32>
    %334 = arith.negf %333 : vector<8x128xf32>
    %335 = math.exp %334 : vector<8x128xf32>
    %cst_53 = arith.constant 1.000000e+00 : f32
    %336 = vector.broadcast %cst_53 : f32 to vector<8x128xf32>
    %337 = arith.addf %336, %335 : vector<8x128xf32>
    %338 = arith.divf %336, %337 : vector<8x128xf32>
    %339 = vector.extract_strided_slice %338 {offsets = [0, 0], sizes = [8, 32], strides = [1, 1]} : vector<8x128xf32> to vector<8x32xf32>
    %340 = vector.extract_strided_slice %338 {offsets = [0, 32], sizes = [8, 32], strides = [1, 1]} : vector<8x128xf32> to vector<8x32xf32>
    %341 = vector.extract_strided_slice %338 {offsets = [0, 96], sizes = [8, 32], strides = [1, 1]} : vector<8x128xf32> to vector<8x32xf32>
    %342 = vector.extract_strided_slice %333 {offsets = [0, 64], sizes = [8, 32], strides = [1, 1]} : vector<8x128xf32> to vector<8x32xf32>
    %343 = math.tanh %342 : vector<8x32xf32>
    %344 = arith.mulf %340, %304 : vector<8x32xf32>
    %345 = arith.mulf %339, %343 : vector<8x32xf32>
    %346 = arith.addf %344, %345 : vector<8x32xf32>
    %347 = math.tanh %346 : vector<8x32xf32>
    %348 = arith.mulf %341, %347 : vector<8x32xf32>
    %349 = arith.mulf %348, %81 : vector<8x32xf32>
    %350 = arith.truncf %349 : vector<8x32xf32> to vector<8x32xbf16>
    %cst_54 = arith.constant dense<0.000000e+00> : vector<8x256xf32>
    %351 = tpu.matmul %350, %15, %cst_54 {dimension_numbers = #tpu.dot_dimension_numbers<[1], [0], [0], [1], [0, 0, 1, 1], [], []>} : vector<8x32xbf16>, vector<32x256xbf16>, vector<8x256xf32> -> vector<8x256xf32>
    %352 = vector.extract_strided_slice %351 {offsets = [0, 128], sizes = [8, 1], strides = [1, 1]} : vector<8x256xf32> to vector<8x1xf32>
    %353 = vector.broadcast %13 : vector<1x1xf32> to vector<8x1xf32>
    %354 = arith.addf %352, %353 : vector<8x1xf32>
    %355 = arith.mulf %125, %117 : vector<8x1xf32>
    %cst_55 = arith.constant 1.000000e+00 : f32
    %356 = vector.broadcast %cst_55 : f32 to vector<8x1xf32>
    %357 = arith.subf %356, %125 : vector<8x1xf32>
    %358 = arith.mulf %357, %354 : vector<8x1xf32>
    %359 = arith.addf %355, %358 : vector<8x1xf32>
    %360 = arith.subf %117, %354 : vector<8x1xf32>
    %361 = math.absf %360 : vector<8x1xf32>
    %362 = arith.mulf %361, %133 : vector<8x1xf32>
    %363 = arith.addf %321, %362 : vector<8x1xf32>
    %c0_56 = arith.constant 0 : index
    %c5 = arith.constant 5 : index
    %364 = vector.load %arg6[%c0_56, %c5] : memref<8x8xf32, #tpu.memory_space<vmem>>, vector<8x1xf32>
    tpu.vector_store %arg6[%c0_56, %c5], %359 {strides = array<i32>} : memref<8x8xf32, #tpu.memory_space<vmem>>, vector<8x1xf32>,
    %365 = vector.extract_strided_slice %351 {offsets = [0, 0], sizes = [8, 128], strides = [1, 1]} : vector<8x256xf32> to vector<8x128xf32>
    %366 = vector.broadcast %359 : vector<8x1xf32> to vector<8x128xf32>
    %367 = vector.broadcast %9 : vector<1x128xf32> to vector<8x128xf32>
    %368 = arith.mulf %366, %367 : vector<8x128xf32>
    %369 = arith.addf %365, %368 : vector<8x128xf32>
    %370 = vector.broadcast %125 : vector<8x1xf32> to vector<8x128xf32>
    %371 = vector.broadcast %10 : vector<1x128xf32> to vector<8x128xf32>
    %372 = arith.mulf %370, %371 : vector<8x128xf32>
    %373 = arith.addf %369, %372 : vector<8x128xf32>
    %374 = vector.broadcast %11 : vector<1x128xf32> to vector<8x128xf32>
    %375 = arith.addf %373, %374 : vector<8x128xf32>
    %376 = arith.negf %375 : vector<8x128xf32>
    %377 = math.exp %376 : vector<8x128xf32>
    %cst_57 = arith.constant 1.000000e+00 : f32
    %378 = vector.broadcast %cst_57 : f32 to vector<8x128xf32>
    %379 = arith.addf %378, %377 : vector<8x128xf32>
    %380 = arith.divf %378, %379 : vector<8x128xf32>
    %381 = vector.extract_strided_slice %380 {offsets = [0, 0], sizes = [8, 32], strides = [1, 1]} : vector<8x128xf32> to vector<8x32xf32>
    %382 = vector.extract_strided_slice %380 {offsets = [0, 32], sizes = [8, 32], strides = [1, 1]} : vector<8x128xf32> to vector<8x32xf32>
    %383 = vector.extract_strided_slice %380 {offsets = [0, 96], sizes = [8, 32], strides = [1, 1]} : vector<8x128xf32> to vector<8x32xf32>
    %384 = vector.extract_strided_slice %375 {offsets = [0, 64], sizes = [8, 32], strides = [1, 1]} : vector<8x128xf32> to vector<8x32xf32>
    %385 = math.tanh %384 : vector<8x32xf32>
    %386 = arith.mulf %382, %346 : vector<8x32xf32>
    %387 = arith.mulf %381, %385 : vector<8x32xf32>
    %388 = arith.addf %386, %387 : vector<8x32xf32>
    %389 = math.tanh %388 : vector<8x32xf32>
    %390 = arith.mulf %383, %389 : vector<8x32xf32>
    %391 = arith.mulf %390, %92 : vector<8x32xf32>
    %392 = arith.truncf %391 : vector<8x32xf32> to vector<8x32xbf16>
    %cst_58 = arith.constant dense<0.000000e+00> : vector<8x256xf32>
    %393 = tpu.matmul %392, %15, %cst_58 {dimension_numbers = #tpu.dot_dimension_numbers<[1], [0], [0], [1], [0, 0, 1, 1], [], []>} : vector<8x32xbf16>, vector<32x256xbf16>, vector<8x256xf32> -> vector<8x256xf32>
    %394 = vector.extract_strided_slice %393 {offsets = [0, 128], sizes = [8, 1], strides = [1, 1]} : vector<8x256xf32> to vector<8x1xf32>
    %395 = vector.broadcast %13 : vector<1x1xf32> to vector<8x1xf32>
    %396 = arith.addf %394, %395 : vector<8x1xf32>
    %397 = arith.mulf %126, %118 : vector<8x1xf32>
    %cst_59 = arith.constant 1.000000e+00 : f32
    %398 = vector.broadcast %cst_59 : f32 to vector<8x1xf32>
    %399 = arith.subf %398, %126 : vector<8x1xf32>
    %400 = arith.mulf %399, %396 : vector<8x1xf32>
    %401 = arith.addf %397, %400 : vector<8x1xf32>
    %402 = arith.subf %118, %396 : vector<8x1xf32>
    %403 = math.absf %402 : vector<8x1xf32>
    %404 = arith.mulf %403, %134 : vector<8x1xf32>
    %405 = arith.addf %363, %404 : vector<8x1xf32>
    %c0_60 = arith.constant 0 : index
    %c6 = arith.constant 6 : index
    %406 = vector.load %arg6[%c0_60, %c6] : memref<8x8xf32, #tpu.memory_space<vmem>>, vector<8x1xf32>
    tpu.vector_store %arg6[%c0_60, %c6], %401 {strides = array<i32>} : memref<8x8xf32, #tpu.memory_space<vmem>>, vector<8x1xf32>,
    %407 = vector.extract_strided_slice %393 {offsets = [0, 0], sizes = [8, 128], strides = [1, 1]} : vector<8x256xf32> to vector<8x128xf32>
    %408 = vector.broadcast %401 : vector<8x1xf32> to vector<8x128xf32>
    %409 = vector.broadcast %9 : vector<1x128xf32> to vector<8x128xf32>
    %410 = arith.mulf %408, %409 : vector<8x128xf32>
    %411 = arith.addf %407, %410 : vector<8x128xf32>
    %412 = vector.broadcast %126 : vector<8x1xf32> to vector<8x128xf32>
    %413 = vector.broadcast %10 : vector<1x128xf32> to vector<8x128xf32>
    %414 = arith.mulf %412, %413 : vector<8x128xf32>
    %415 = arith.addf %411, %414 : vector<8x128xf32>
    %416 = vector.broadcast %11 : vector<1x128xf32> to vector<8x128xf32>
    %417 = arith.addf %415, %416 : vector<8x128xf32>
    %418 = arith.negf %417 : vector<8x128xf32>
    %419 = math.exp %418 : vector<8x128xf32>
    %cst_61 = arith.constant 1.000000e+00 : f32
    %420 = vector.broadcast %cst_61 : f32 to vector<8x128xf32>
    %421 = arith.addf %420, %419 : vector<8x128xf32>
    %422 = arith.divf %420, %421 : vector<8x128xf32>
    %423 = vector.extract_strided_slice %422 {offsets = [0, 0], sizes = [8, 32], strides = [1, 1]} : vector<8x128xf32> to vector<8x32xf32>
    %424 = vector.extract_strided_slice %422 {offsets = [0, 32], sizes = [8, 32], strides = [1, 1]} : vector<8x128xf32> to vector<8x32xf32>
    %425 = vector.extract_strided_slice %422 {offsets = [0, 96], sizes = [8, 32], strides = [1, 1]} : vector<8x128xf32> to vector<8x32xf32>
    %426 = vector.extract_strided_slice %417 {offsets = [0, 64], sizes = [8, 32], strides = [1, 1]} : vector<8x128xf32> to vector<8x32xf32>
    %427 = math.tanh %426 : vector<8x32xf32>
    %428 = arith.mulf %424, %388 : vector<8x32xf32>
    %429 = arith.mulf %423, %427 : vector<8x32xf32>
    %430 = arith.addf %428, %429 : vector<8x32xf32>
    %431 = math.tanh %430 : vector<8x32xf32>
    %432 = arith.mulf %425, %431 : vector<8x32xf32>
    %433 = arith.mulf %432, %103 : vector<8x32xf32>
    %434 = arith.truncf %433 : vector<8x32xf32> to vector<8x32xbf16>
    %cst_62 = arith.constant dense<0.000000e+00> : vector<8x256xf32>
    %435 = tpu.matmul %434, %15, %cst_62 {dimension_numbers = #tpu.dot_dimension_numbers<[1], [0], [0], [1], [0, 0, 1, 1], [], []>} : vector<8x32xbf16>, vector<32x256xbf16>, vector<8x256xf32> -> vector<8x256xf32>
    %436 = vector.extract_strided_slice %435 {offsets = [0, 128], sizes = [8, 1], strides = [1, 1]} : vector<8x256xf32> to vector<8x1xf32>
    %437 = vector.broadcast %13 : vector<1x1xf32> to vector<8x1xf32>
    %438 = arith.addf %436, %437 : vector<8x1xf32>
    %439 = arith.mulf %127, %119 : vector<8x1xf32>
    %cst_63 = arith.constant 1.000000e+00 : f32
    %440 = vector.broadcast %cst_63 : f32 to vector<8x1xf32>
    %441 = arith.subf %440, %127 : vector<8x1xf32>
    %442 = arith.mulf %441, %438 : vector<8x1xf32>
    %443 = arith.addf %439, %442 : vector<8x1xf32>
    %444 = arith.subf %119, %438 : vector<8x1xf32>
    %445 = math.absf %444 : vector<8x1xf32>
    %446 = arith.mulf %445, %135 : vector<8x1xf32>
    %447 = arith.addf %405, %446 : vector<8x1xf32>
    %c0_64 = arith.constant 0 : index
    %c7 = arith.constant 7 : index
    %448 = vector.load %arg6[%c0_64, %c7] : memref<8x8xf32, #tpu.memory_space<vmem>>, vector<8x1xf32>
    tpu.vector_store %arg6[%c0_64, %c7], %443 {strides = array<i32>} : memref<8x8xf32, #tpu.memory_space<vmem>>, vector<8x1xf32>,
    %449 = vector.extract_strided_slice %435 {offsets = [0, 0], sizes = [8, 128], strides = [1, 1]} : vector<8x256xf32> to vector<8x128xf32>
    %450 = vector.broadcast %443 : vector<8x1xf32> to vector<8x128xf32>
    %451 = vector.broadcast %9 : vector<1x128xf32> to vector<8x128xf32>
    %452 = arith.mulf %450, %451 : vector<8x128xf32>
    %453 = arith.addf %449, %452 : vector<8x128xf32>
    %454 = vector.broadcast %127 : vector<8x1xf32> to vector<8x128xf32>
    %455 = vector.broadcast %10 : vector<1x128xf32> to vector<8x128xf32>
    %456 = arith.mulf %454, %455 : vector<8x128xf32>
    %457 = arith.addf %453, %456 : vector<8x128xf32>
    %458 = vector.broadcast %11 : vector<1x128xf32> to vector<8x128xf32>
    %459 = arith.addf %457, %458 : vector<8x128xf32>
    %460 = arith.negf %459 : vector<8x128xf32>
    %461 = math.exp %460 : vector<8x128xf32>
    %cst_65 = arith.constant 1.000000e+00 : f32
    %462 = vector.broadcast %cst_65 : f32 to vector<8x128xf32>
    %463 = arith.addf %462, %461 : vector<8x128xf32>
    %464 = arith.divf %462, %463 : vector<8x128xf32>
    %465 = vector.extract_strided_slice %464 {offsets = [0, 0], sizes = [8, 32], strides = [1, 1]} : vector<8x128xf32> to vector<8x32xf32>
    %466 = vector.extract_strided_slice %464 {offsets = [0, 32], sizes = [8, 32], strides = [1, 1]} : vector<8x128xf32> to vector<8x32xf32>
    %467 = vector.extract_strided_slice %464 {offsets = [0, 96], sizes = [8, 32], strides = [1, 1]} : vector<8x128xf32> to vector<8x32xf32>
    %468 = vector.extract_strided_slice %459 {offsets = [0, 64], sizes = [8, 32], strides = [1, 1]} : vector<8x128xf32> to vector<8x32xf32>
    %469 = math.tanh %468 : vector<8x32xf32>
    %470 = arith.mulf %466, %430 : vector<8x32xf32>
    %471 = arith.mulf %465, %469 : vector<8x32xf32>
    %472 = arith.addf %470, %471 : vector<8x32xf32>
    %473 = math.tanh %472 : vector<8x32xf32>
    %474 = arith.mulf %467, %473 : vector<8x32xf32>
    %475 = vector.shape_cast %447 : vector<8x1xf32> to vector<1x8x1xf32>
    %cst_66 = arith.constant dense<0.000000e+00> : vector<1xf32>
    %476 = vector.multi_reduction <add>, %475, %cst_66 [1, 2] : vector<1x8x1xf32> to vector<1xf32>
    %477 = vector.shape_cast %476 : vector<1xf32> to vector<1x1x1xf32>
    %478 = vector.extract %477[0, 0, 0] : f32 from vector<1x1x1xf32>
    %479 = vector.broadcast %12 : vector<1x32xf32> to vector<8x32xf32>
    %480 = arith.mulf %474, %479 : vector<8x32xf32>
    %cst_67 = arith.constant dense<0.000000e+00> : vector<8xf32>
    %481 = vector.multi_reduction <add>, %480, %cst_67 [1] : vector<8x32xf32> to vector<8xf32>
    %482 = vector.shape_cast %481 : vector<8xf32> to vector<8x1xf32>
    %483 = vector.broadcast %14 : vector<1x1xf32> to vector<8x1xf32>
    %484 = arith.addf %482, %483 : vector<8x1xf32>
    %c0_68 = arith.constant 0 : index
    %c0_69 = arith.constant 0 : index
    %485 = vector.load %arg1[%c0_68, %c0_69] : memref<8x2xf32, #tpu.memory_space<vmem>>, vector<8x1xf32>
    %c0_70 = arith.constant 0 : index
    %c1_71 = arith.constant 1 : index
    %486 = vector.load %arg1[%c0_70, %c1_71] : memref<8x2xf32, #tpu.memory_space<vmem>>, vector<8x1xf32>
    %cst_72 = arith.constant 0.000000e+00 : f32
    %487 = vector.broadcast %cst_72 : f32 to vector<8x1xf32>
    %488 = arith.subf %487, %484 : vector<8x1xf32>
    %cst_73 = arith.constant 0.000000e+00 : f32
    %489 = vector.broadcast %cst_73 : f32 to vector<8x1xf32>
    %490 = arith.maximumf %488, %489 : vector<8x1xf32>
    %491 = arith.mulf %484, %485 : vector<8x1xf32>
    %492 = arith.subf %484, %491 : vector<8x1xf32>
    %493 = arith.addf %492, %490 : vector<8x1xf32>
    %cst_74 = arith.constant 0.000000e+00 : f32
    %494 = vector.broadcast %cst_74 : f32 to vector<8x1xf32>
    %495 = arith.subf %494, %490 : vector<8x1xf32>
    %496 = math.exp %495 : vector<8x1xf32>
    %cst_75 = arith.constant 0.000000e+00 : f32
    %497 = vector.broadcast %cst_75 : f32 to vector<8x1xf32>
    %498 = arith.subf %497, %484 : vector<8x1xf32>
    %499 = arith.subf %498, %490 : vector<8x1xf32>
    %500 = math.exp %499 : vector<8x1xf32>
    %501 = arith.addf %496, %500 : vector<8x1xf32>
    %502 = math.log %501 : vector<8x1xf32>
    %503 = arith.addf %493, %502 : vector<8x1xf32>
    %504 = arith.mulf %503, %486 : vector<8x1xf32>
    %505 = vector.shape_cast %504 : vector<8x1xf32> to vector<1x8x1xf32>
    %cst_76 = arith.constant dense<0.000000e+00> : vector<1xf32>
    %506 = vector.multi_reduction <add>, %505, %cst_76 [1, 2] : vector<1x8x1xf32> to vector<1xf32>
    %507 = vector.shape_cast %506 : vector<1xf32> to vector<1x1x1xf32>
    %508 = vector.extract %507[0, 0, 0] : f32 from vector<1x1x1xf32>
    %509 = vector.shape_cast %486 : vector<8x1xf32> to vector<1x8x1xf32>
    %cst_77 = arith.constant dense<0.000000e+00> : vector<1xf32>
    %510 = vector.multi_reduction <add>, %509, %cst_77 [1, 2] : vector<1x8x1xf32> to vector<1xf32>
    %511 = vector.shape_cast %510 : vector<1xf32> to vector<1x1x1xf32>
    %512 = vector.extract %511[0, 0, 0] : f32 from vector<1x1x1xf32>
    %cst_78 = arith.constant 9.99999974E-6 : f32
    %513 = arith.addf %512, %cst_78 : f32
    %514 = arith.divf %508, %513 : f32
    %cst_79 = arith.constant 3.000000e-01 : f32
    %515 = arith.mulf %478, %cst_79 : f32
    %cst_80 = arith.constant 1.000000e+00 : f32
    %516 = arith.mulf %514, %cst_80 : f32
    %517 = arith.addf %515, %516 : f32
    %c0_81 = arith.constant 0 : index
    %518 = memref.load %arg4[%c0_81] : memref<1xf32, #tpu.memory_space<smem>>
    memref.store %517, %arg4[%c0_81] : memref<1xf32, #tpu.memory_space<smem>>
    %519 = arith.negf %484 : vector<8x1xf32>
    %520 = math.exp %519 : vector<8x1xf32>
    %cst_82 = arith.constant 1.000000e+00 : f32
    %521 = vector.broadcast %cst_82 : f32 to vector<8x1xf32>
    %522 = arith.addf %521, %520 : vector<8x1xf32>
    %523 = arith.divf %521, %522 : vector<8x1xf32>
    %c0_83 = arith.constant 0 : index
    %c0_84 = arith.constant 0 : index
    %524 = vector.load %arg5[%c0_83, %c0_84] : memref<8x1xf32, #tpu.memory_space<vmem>>, vector<8x1xf32>
    tpu.vector_store %arg5[%c0_83, %c0_84], %523 {strides = array<i32>} : memref<8x1xf32, #tpu.memory_space<vmem>>, vector<8x1xf32>,
    return
  }
}

</mosaic_0001>

<bundles_post_ra>
// kernel: tpu_custom_call.1
= control target key start
LH: loop header
LB: loop body
LE: loop exit
PB: predicated region body
PF: predicated region fallthrough
CT: control target
= control target key end

     0   :  { %12 = vsyncpa [#allocation3], 0  ;;  %s1849_s0 = inlined_call_operand.hbm [shape: f32[3,8,8], index: 0, kind: input, shape index: {}]   ;;  %s1850_s1 = inlined_call_operand.vmem [shape: f32[8,2], index: 1, kind: input, shape index: {}]   ;;  %s1851_s2 = inlined_call_operand.vmem [shape: f32[8,128], index: 2, kind: input, shape index: {}]   ;;  %s1852_s3 = inlined_call_operand.hbm [shape: bf16[32,256], index: 3, kind: input, shape index: {}]   ;;  %s1853_s4 = inlined_call_operand.hbm [shape: f32[1], index: 4, kind: output, shape index: {0}]   ;;  %s1854_s5 = inlined_call_operand.vmem [shape: f32[8,1], index: 5, kind: output, shape index: {1}]   ;;  %s1855_s6 = inlined_call_operand.hbm [shape: f32[8,8], index: 6, kind: output, shape index: {2}]  }
   0x1   :  { %13 = vsyncpa [#allocation7], 0 }
   0x2   :  { %14 = vsyncpa [#allocation5], 0 }
   0x3   :  { %15 = vsyncpa [#allocation4], 0  ;;  %s1441_s21 = smov [#allocation2]   ;;  %s1357_s25 = scalar_lea.hbm %s1849_s0, 384 }
   0x4   :  { %s21_s22 = sshll.u32 %s1441_s21, 4  ;;  %p1358_p0 = scmp.ne.s32.totalorder %s1849_s0, %s1357_s25  ;;  %s22_s22 = int_to_ptr.vmem [resolvable:$true] %s21_s22 }
   0x5   :  { %p1361_p1 = scmp.lt.u32.totalorder %s1357_s25, %s1849_s0 }
   0x7   :  { %p1363_p2 = pnand %p1361_p1, %p1358_p0 }
   0x9   :  { %1366 = shalt.err (!%p1363_p2)
}
   0xa   :  { %s1367_s30 = scalar_lea.vmem %s22_s22, 384  ;;  %p1372_p4 = scmp.lt.s32.totalorder %s22_s22, %s22_s22 }
   0xb   :  { %p1368_p3 = scmp.ne.s32.totalorder %s22_s22, %s1367_s30  ;;  %p1373_p5 = scmp.lt.s32.totalorder %s1367_s30, %s1367_s30 }
   0xd   :  { %p1374_p6 = por %p1373_p5, %p1372_p4 }
   0xf   :  { %p1375_p7 = pnand %p1374_p6, %p1368_p3 }
  0x11   :  { %1378 = shalt.err (!%p1375_p7)
}
  0x12   :  { %s1442_s7 = smov 128   ;;  %s1443_s8 = smov 8  }
  0x13   :  { %27 = dma.hbm_to_vmem [thread:$0]  %s1849_s0, 384, %s22_s22, [#allocation3], %s1442_s7, %s1442_s7, %s1443_s8  }
  0x14   :  { %s1444_s11 = smov [#allocation6]   ;;  %s1379_s15 = scalar_lea.hbm %s1852_s3, 512 }
  0x15   :  { %s37_s12 = sshll.u32 %s1444_s11, 4  ;;  %p1380_p8 = scmp.ne.s32.totalorder %s1852_s3, %s1379_s15  ;;  %s38_s12 = int_to_ptr.vmem [resolvable:$true] %s37_s12 }
  0x16   :  { %p1383_p9 = scmp.lt.u32.totalorder %s1379_s15, %s1852_s3 }
  0x18   :  { %p1385_p10 = pnand %p1383_p9, %p1380_p8 }
  0x1a   :  { %1388 = shalt.err (!%p1385_p10)
}
  0x1b   :  { %s1389_s20 = scalar_lea.vmem %s38_s12, 512  ;;  %p1394_p12 = scmp.lt.s32.totalorder %s38_s12, %s38_s12 }
  0x1c   :  { %p1390_p11 = scmp.ne.s32.totalorder %s38_s12, %s1389_s20  ;;  %p1395_p13 = scmp.lt.s32.totalorder %s1389_s20, %s1389_s20 }
  0x1e   :  { %p1396_p0 = por %p1395_p13, %p1394_p12 }
  0x20   :  { %p1397_p1 = pnand %p1396_p0, %p1390_p11 }
  0x22   :  { %1400 = shalt.err (!%p1397_p1)
}
  0x23   :  { %43 = dma.hbm_to_vmem [thread:$0]  %s1852_s3, 512, %s38_s12, [#allocation7], %s1442_s7, %s1442_s7, %s1443_s8  }
  0x24   :  { %1433 = dma.done.wait [#allocation3], 384  }
  0x25   :  { %1434 = vsyncadd [#allocation3], 4294966912 }
  0x26   :  { %1435 = dma.done.wait [#allocation7], 512  }
  0x27   :  { %1436 = vsyncadd [#allocation7], 4294966784  ;;  %v1445_v0 = vmov 0   ;;  %v1535_v1 = vld [vmem:[#allocation2 + $0x10] sm:$0xff]  ;;  %v1538_v2 = vld [vmem:[#allocation6 + $0x4] ss:$8 sps:$4 sm:$0xff]   ;;  %v66_v6 = vlaneseq }
  0x28   :  { %1239 = vset.pattern.permute.xlu0 %v1445_v0  ;;  %220 = vmatprep.mubr.bf16.mxu0 %v1445_v0  ;;  %v1540_v3 = vld [vmem:[#allocation6] ss:$8 sps:$4 sm:$0xff]   ;;  %v1546_v4 = vld [vmem:[#allocation6 + $0x14] ss:$8 sps:$4 sm:$0xff]   ;;  %v1548_v5 = vld [vmem:[#allocation6 + $0x10] ss:$8 sps:$4 sm:$0xff]  }
  0x29   :  { %1240 = vset.pattern.permute.xlu1 %v1445_v0  ;;  %339 = vmatprep.mubr.bf16.mxu1 %v1445_v0  ;;  %v1556_v7 = vshrl.u32 %v66_v6, 7  ;;  %v1562_v9 = vld [vmem:[%s1851_s2] sm:$0xff]  ;;  %vm184_vm0 = vcmask 261120   ;;  %v1579_v22 = vld [vmem:[#allocation2 + $0x8] sm:$0xff]  ;;  %vm242_vm1 = vcmask 7168   ;;  %v1446_v35 = vmov 1  }
  0x2a   :  { %63 = vperm.xlu0 %1239, %v1535_v1   ;;  %188 = vmatprep.subr.bf16.mxu0 %v1538_v2  ;;  %v1586_v25 = vld [vmem:[#allocation2] sm:$0xff]  ;;  %v1589_v27 = vsub.f32 1.0, %v1579_v22  ;;  %s1447_s2 = smov 64   ;;  %s1448_s23 = smov 32   ;;  %vm363_vm2 = vcmask 15368   ;;  %vm471_vm3 = vcmask 23568  }
  0x2b   :  { %307 = vmatprep.subr.bf16.mxu1 %v1538_v2  ;;  %189 = vmatpush1.bf16.msra.mxu0 %v1540_v3  ;;  %v68_v8 = vsub.s32 0, %v1556_v7  ;;  %v73_v10 = vsub.s32 1, %v1556_v7  ;;  %v231_v23 = vsub.s32 6, %v1556_v7  ;;  %v1596_v31 = vmul.f32 %v1579_v22, %v1586_v25  ;;  %s1449_s24 = smov 96   ;;  %s1450_s25 = smov 1  }
  0x2c   :  { %308 = vmatpush1.bf16.msra.mxu1 %v1540_v3  ;;  %190 = vmatprep.subr.bf16.mxu0 %v1546_v4  ;;  %v251_v36 = vsub.s32 2, %v1556_v7  ;;  %v262_v37 = vsub.s32 3, %v1556_v7  ;;  %v268_v41 = vsub.s32 4, %v1556_v7  ;;  %s1452_s26 = smov 2   ;;  %s1454_s27 = smov 3   ;;  %vm579_vm4 = vcmask 31768  }
  0x2d   :  { %309 = vmatprep.subr.bf16.mxu1 %v1546_v4  ;;  %v1566_v11 = vrot.slane %v1562_v9, %v68_v8  ;;  %v1569_v12 = vrot.slane %v1562_v9, %v73_v10  ;;  %257 = vperm.xlu1 %1240, %v1579_v22   ;;  %v1584_v24 = vrot.slane %v1562_v9, %v231_v23  ;;  %s1456_s28 = smov 4   ;;  %vm687_vm5 = vcmask 39968   ;;  %s1458_s29 = smov 5  }
  0x2e   :  { %v1606_v38 = vrot.slane %v1562_v9, %v251_v36  ;;  %v1609_v39 = vrot.slane %v1562_v9, %v262_v37  ;;  %v1615_v46 = vrot.slane %v1562_v9, %v268_v41  ;;  %vm795_vm6 = vcmask 48168   ;;  %s1460_s30 = smov 6   ;;  %s1462_s7 = smov 7  }
  0x2f   :  { %191 = vmatpush1.bf16.msra.mxu0 %v1548_v5  ;;  %vm903_vm7 = vcmask 56368   ;;  %vm1011_vm8 = vcmask 64568   ;;  %vm150_vm9 = vcmask 64512   ;;  %s1463_s10 = smov 127   ;;  %s1465_s11 = smov 125  }
  0x30   :  { %310 = vmatpush1.bf16.msra.mxu1 %v1548_v5  ;;  %415 = vmatprep.subr.bf16.mxu0 %v1538_v2  ;;  %s1466_s12 = smov 124   ;;  %s1467_s13 = smov 123  }
  0x31   :  { %523 = vmatprep.subr.bf16.mxu1 %v1538_v2  ;;  %1242 = vset.pattern.permute.xlu1 %v1446_v35  ;;  %s1468_s14 = smov 122   ;;  %s1469_s15 = smov 121  }
  0x32   :  { %s1470_s18 = smov [#allocation9]  }
  0x33   :  { %s1162_s19 = sshll.u32 %s1470_s18, 4  ;;  %s1163_s19 = int_to_ptr.vmem [resolvable:$true] %s1162_s19 }
  0x34   :  { %s1401_s20 = scalar_lea.vmem %s1163_s19, 128  ;;  %p1406_p3 = scmp.lt.s32.totalorder %s1163_s19, %s1163_s19 }
  0x35   :  { %p1402_p2 = scmp.ne.s32.totalorder %s1163_s19, %s1401_s20  ;;  %p1407_p4 = scmp.lt.s32.totalorder %s1401_s20, %s1401_s20 }
  0x37   :  { %p1408_p5 = por %p1407_p4, %p1406_p3 }
  0x39   :  { %p1409_p6 = pnand %p1408_p5, %p1402_p2 }
  0xa9   :  { %v64_v13 = vpop.permute.xlu0 %63 }
  0xaa   :  { %v70_v14 = vmul.f32 %v1566_v11, %v64_v13 }
  0xac   :  { %v75_v15 = vadd.f32 %v1569_v12, %v70_v14  ;;  %v258_v40 = vpop.permute.xlu1 %257 }
  0xad   :  { %v264_v44 = vmul.f32 %v1609_v39, %v258_v40 }
  0xae   :  { %v76_v16 = vmax.f32 %v75_v15, 0.0 }
  0xb0   :  { %v77_v17 = vsub.f32 0.0, %v76_v16 }
  0xb2   :  { %v78_v18 = vmul.f32 1.442695, %v77_v17 }
  0xb4   :  { %1261 = vpow2.f32 %v78_v18 }
  0xbe   :  { %v1262_v19 = vpop.eup %1261 }
  0xbf   :  { %v162_v20 = vmul.f32 0.0, %v1262_v19 }
  0xc1   :  { %v163_v21 = vpack.c.bf16 %v162_v20, %v162_v20 }
  0xc3   :  { %1183 = vmatmul.mubr.msk.bf16.vlgmr.msra.gmra.mrb[0].mxu0 %vm184_vm0, %v163_v21 }
  0xc4   :  { %416 = vmatpush1.bf16.msra.mxu0 %v1540_v3  ;;  %447 = vmatprep.mubr.bf16.mxu0 %v1445_v0 }
  0xc5   :  { %417 = vmatprep.subr.bf16.mxu0 %v1546_v4 }
  0xc8   :  { %418 = vmatpush1.bf16.msra.mxu0 %v1548_v5 }
  0xc9   :  { %631 = vmatprep.subr.bf16.mxu0 %v1538_v2 }
 0x196   :  { %v222_v26 = vpop.f32.mrb[0].mxu0 }
 0x197   :  { %v224_v28 = vpop.f32.mrb[1].mxu0 }
 0x198   :  { %v1592_v29 = vadd.f32 %v1584_v24, %v224_v28  ;;  %v226_v30 = vpop.f32.mrb[2].mxu0 }
 0x199   :  { %v227_v32 = vpop.f32.mrb[3].mxu0 }
 0x19a   :  { %v236_v33 = vmul.f32 %v1589_v27, %v1592_v29 }
 0x19c   :  { %v237_v34 = vadd.f32 %v236_v33, %v1596_v31  ;;  %v1451_v33 = vmov 2  }
 0x19e   :  { %246 = vperm.xlu0 %1239, %v237_v34   ;;  %243 = vst.msk [vmem:[#allocation9] sm:$0xff] %vm242_vm1, %v237_v34 }
 0x1a2   :  { %1241 = vset.pattern.permute.xlu0 %v1446_v35 }
 0x1a3   :  { %81 = vperm.xlu0 %1241, %v1535_v1  }
 0x21d   :  { %v247_v42 = vpop.permute.xlu0 %246 }
 0x21e   :  { %v253_v43 = vmul.f32 %v1606_v38, %v247_v42 }
 0x220   :  { %v254_v45 = vadd.f32 %v253_v43, %v222_v26 }
 0x222   :  { %v265_v47 = vadd.f32 %v264_v44, %v254_v45  ;;  %v82_v50 = vpop.permute.xlu0 %81 }
 0x223   :  { %v84_v52 = vmul.f32 %v82_v50, %v1566_v11 }
 0x224   :  { %v270_v48 = vadd.f32 %v1615_v46, %v265_v47 }
 0x225   :  { %v85_v53 = vadd.f32 %v84_v52, %v1569_v12 }
 0x226   :  { %1263 = vtanh.f32 %v270_v48  ;;  %v1184_v51 = vmul.f32 -1.442695, %v270_v48 }
 0x227   :  { %v86_v54 = vmax.f32 %v85_v53, 0.0 }
 0x228   :  { %1265 = vpow2.f32 %v1184_v51 }
 0x229   :  { %v87_v56 = vsub.f32 0.0, %v86_v54 }
 0x22b   :  { %v88_v58 = vmul.f32 1.442695, %v87_v56 }
 0x230   :  { %v1264_v49 = vpop.eup %1263 }
 0x231   :  { %280 = vrot.lane.b32.xlu1 %v1264_v49, %s1447_s2 }
 0x232   :  { %v1266_v55 = vpop.eup %1265 }
 0x233   :  { %v274_v57 = vadd.f32 1.0, %v1266_v55 }
 0x235   :  { %1267 = vrcp.f32 %v274_v57 }
 0x236   :  { %1269 = vpow2.f32 %v88_v58 }
 0x23f   :  { %v1268_v59 = vpop.eup %1267 }
 0x240   :  { %v1270_v61 = vpop.eup %1269  ;;  %v278_v63 = vmul.f32 0.0, %v1268_v59 }
 0x241   :  { %296 = vrot.lane.b32.xlu0 %v1270_v61, %s1449_s24 }
 0x2a3   :  { %v281_v60 = vpop.permute.xlu1 %280 }
 0x2a4   :  { %v283_v62 = vmul.f32 %v1268_v59, %v281_v60 }
 0x2a6   :  { %285 = vrot.lane.b32.xlu1 %v283_v62, %s1448_s23 }
 0x2b3   :  { %v297_v14 = vpop.permute.xlu0 %296 }
 0x318   :  { %v286_v6 = vpop.permute.xlu1 %285 }
 0x319   :  { %v1623_v8 = vadd.f32 %v286_v6, %v278_v63 }
 0x31b   :  { %1271 = vtanh.f32 %v1623_v8 }
 0x325   :  { %v1272_v10 = vpop.eup %1271 }
 0x326   :  { %291 = vrot.lane.b32.xlu1 %v1272_v10, %s1447_s2 }
 0x398   :  { %v292_v13 = vpop.permute.xlu1 %291 }
 0x399   :  { %v294_v15 = vmul.f32 %v1268_v59, %v292_v13 }
 0x39b   :  { %v299_v16 = vmul.f32 %v297_v14, %v294_v15 }
 0x39d   :  { %v300_v17 = vpack.c.bf16 %v299_v16, %v299_v16 }
 0x39f   :  { %302 = vrot.lane.b32.xlu1 %v300_v17, %s1448_s23 }
 0x411   :  { %v303_v18 = vpop.permute.xlu1 %302 }
 0x412   :  { %1185 = vmatmul.mubr.msk.bf16.vlgmr.msra.gmra.mrb[0].mxu1 %vm184_vm0, %v303_v18 }
 0x413   :  { %524 = vmatpush1.bf16.msra.mxu1 %v1540_v3  ;;  %555 = vmatprep.mubr.bf16.mxu1 %v1445_v0 }
 0x414   :  { %525 = vmatprep.subr.bf16.mxu1 %v1546_v4 }
 0x417   :  { %526 = vmatpush1.bf16.msra.mxu1 %v1548_v5 }
 0x418   :  { %739 = vmatprep.subr.bf16.mxu1 %v1538_v2 }
 0x4e5   :  { %v341_v19 = vpop.f32.mrb[0].mxu1 }
 0x4e6   :  { %v343_v20 = vpop.f32.mrb[1].mxu1 }
 0x4e7   :  { %v348_v21 = vadd.f32 %v343_v20, %v1584_v24  ;;  %v345_v23 = vpop.f32.mrb[2].mxu1 }
 0x4e8   :  { %v346_v26 = vpop.f32.mrb[3].mxu1  ;;  %v1453_v23 = vmov 3  }
 0x4e9   :  { %350 = vrot.lane.b32.xlu0 %v348_v21, %s1450_s25 }
 0x4ed   :  { %373 = vperm.xlu0 %1241, %v1579_v22  }
 0x4f1   :  { %1243 = vset.pattern.permute.xlu0 %v1451_v33 }
 0x4f2   :  { %91 = vperm.xlu0 %1243, %v1535_v1  }
 0x55b   :  { %v1637_v28 = vpop.permute.xlu0 %350 }
 0x55c   :  { %v353_v30 = vmul.f32 %v1637_v28, %v1589_v27 }
 0x55e   :  { %v354_v32 = vadd.f32 %v353_v30, %v1596_v31 }
 0x560   :  { %367 = vperm.xlu1 %1242, %v354_v32   ;;  %364 = vst.msk [vmem:[#allocation9] sm:$0xff] %vm363_vm2, %v354_v32 }
 0x564   :  { %1244 = vset.pattern.permute.xlu1 %v1451_v33 }
 0x56c   :  { %v374_v34 = vpop.permute.xlu0 %373 }
 0x56d   :  { %v376_v37 = vmul.f32 %v374_v34, %v1609_v39 }
 0x571   :  { %v92_v44 = vpop.permute.xlu0 %91 }
 0x572   :  { %v94_v45 = vmul.f32 %v92_v44, %v1566_v11 }
 0x574   :  { %v95_v47 = vadd.f32 %v94_v45, %v1569_v12 }
 0x576   :  { %v96_v48 = vmax.f32 %v95_v47, 0.0 }
 0x578   :  { %v97_v49 = vsub.f32 0.0, %v96_v48 }
 0x57a   :  { %v98_v50 = vmul.f32 1.442695, %v97_v49 }
 0x5df   :  { %v368_v35 = vpop.permute.xlu1 %367 }
 0x5e0   :  { %v370_v36 = vmul.f32 %v368_v35, %v1606_v38 }
 0x5e2   :  { %v371_v40 = vadd.f32 %v370_v36, %v341_v19 }
 0x5e4   :  { %v377_v41 = vadd.f32 %v376_v37, %v371_v40 }
 0x5e6   :  { %v378_v42 = vadd.f32 %v377_v41, %v1615_v46 }
 0x5e8   :  { %1273 = vtanh.f32 %v378_v42  ;;  %v1186_v52 = vmul.f32 -1.442695, %v378_v42 }
 0x5e9   :  { %1275 = vpow2.f32 %v98_v50 }
 0x5ea   :  { %1277 = vpow2.f32 %v1186_v52 }
 0x5f2   :  { %v1274_v43 = vpop.eup %1273 }
 0x5f3   :  { %388 = vrot.lane.b32.xlu1 %v1274_v43, %s1447_s2  ;;  %v1276_v51 = vpop.eup %1275 }
 0x5f4   :  { %404 = vrot.lane.b32.xlu0 %v1276_v51, %s1449_s24  ;;  %v1278_v53 = vpop.eup %1277 }
 0x5f5   :  { %v382_v54 = vadd.f32 1.0, %v1278_v53 }
 0x5f7   :  { %1279 = vrcp.f32 %v382_v54 }
 0x601   :  { %v1280_v55 = vpop.eup %1279 }
 0x602   :  { %v386_v58 = vmul.f32 %v1280_v55, %v1623_v8 }
 0x665   :  { %v389_v56 = vpop.permute.xlu1 %388 }
 0x666   :  { %v391_v57 = vmul.f32 %v1280_v55, %v389_v56  ;;  %v405_v63 = vpop.permute.xlu0 %404 }
 0x668   :  { %393 = vrot.lane.b32.xlu1 %v391_v57, %s1448_s23 }
 0x6da   :  { %v394_v59 = vpop.permute.xlu1 %393 }
 0x6db   :  { %v1652_v60 = vadd.f32 %v394_v59, %v386_v58 }
 0x6dd   :  { %1281 = vtanh.f32 %v1652_v60 }
 0x6e7   :  { %v1282_v61 = vpop.eup %1281 }
 0x6e8   :  { %399 = vrot.lane.b32.xlu1 %v1282_v61, %s1447_s2 }
 0x75a   :  { %v400_v62 = vpop.permute.xlu1 %399 }
 0x75b   :  { %v402_v6 = vmul.f32 %v1280_v55, %v400_v62 }
 0x75d   :  { %v407_v10 = vmul.f32 %v405_v63, %v402_v6 }
 0x75f   :  { %v408_v13 = vpack.c.bf16 %v407_v10, %v407_v10 }
 0x761   :  { %410 = vrot.lane.b32.xlu1 %v408_v13, %s1448_s23 }
 0x7d3   :  { %v411_v14 = vpop.permute.xlu1 %410 }
 0x7d4   :  { %1187 = vmatmul.mubr.msk.bf16.vlgmr.msra.gmra.mrb[4].mxu0 %vm184_vm0, %v411_v14 }
 0x7d5   :  { %632 = vmatpush1.bf16.msra.mxu0 %v1540_v3  ;;  %663 = vmatprep.mubr.bf16.mxu0 %v1445_v0 }
 0x7d6   :  { %633 = vmatprep.subr.bf16.mxu0 %v1546_v4 }
 0x7d9   :  { %634 = vmatpush1.bf16.msra.mxu0 %v1548_v5 }
 0x7da   :  { %847 = vmatprep.subr.bf16.mxu0 %v1538_v2 }
 0x8a7   :  { %v449_v8 = vpop.f32.mrb[4].mxu0 }
 0x8a8   :  { %v451_v15 = vpop.f32.mrb[5].mxu0 }
 0x8a9   :  { %v456_v16 = vadd.f32 %v451_v15, %v1584_v24  ;;  %v453_v17 = vpop.f32.mrb[6].mxu0 }
 0x8aa   :  { %v454_v18 = vpop.f32.mrb[7].mxu0 }
 0x8ab   :  { %458 = vrot.lane.b32.xlu0 %v456_v16, %s1452_s26 }
 0x8af   :  { %481 = vperm.xlu0 %1243, %v1579_v22  }
 0x8b3   :  { %1245 = vset.pattern.permute.xlu0 %v1453_v23 }
 0x8b4   :  { %101 = vperm.xlu0 %1245, %v1535_v1  }
 0x91d   :  { %v1665_v19 = vpop.permute.xlu0 %458 }
 0x91e   :  { %v461_v20 = vmul.f32 %v1665_v19, %v1589_v27 }
 0x920   :  { %v462_v21 = vadd.f32 %v461_v20, %v1596_v31 }
 0x922   :  { %475 = vperm.xlu1 %1244, %v462_v21   ;;  %472 = vst.msk [vmem:[#allocation9] sm:$0xff] %vm471_vm3, %v462_v21 }
 0x926   :  { %1246 = vset.pattern.permute.xlu1 %v1453_v23 }
 0x92e   :  { %v482_v26 = vpop.permute.xlu0 %481 }
 0x92f   :  { %v484_v33 = vmul.f32 %v482_v26, %v1609_v39 }
 0x933   :  { %v102_v40 = vpop.permute.xlu0 %101 }
 0x934   :  { %v104_v41 = vmul.f32 %v102_v40, %v1566_v11 }
 0x936   :  { %v105_v42 = vadd.f32 %v104_v41, %v1569_v12 }
 0x938   :  { %v106_v43 = vmax.f32 %v105_v42, 0.0 }
 0x93a   :  { %v107_v44 = vsub.f32 0.0, %v106_v43 }
 0x93c   :  { %v108_v45 = vmul.f32 1.442695, %v107_v44 }
 0x9a1   :  { %v476_v30 = vpop.permute.xlu1 %475 }
 0x9a2   :  { %v478_v32 = vmul.f32 %v476_v30, %v1606_v38 }
 0x9a4   :  { %v479_v34 = vadd.f32 %v478_v32, %v449_v8 }
 0x9a6   :  { %v485_v35 = vadd.f32 %v484_v33, %v479_v34 }
 0x9a8   :  { %v486_v36 = vadd.f32 %v485_v35, %v1615_v46 }
 0x9aa   :  { %1283 = vtanh.f32 %v486_v36  ;;  %v1188_v48 = vmul.f32 -1.442695, %v486_v36 }
 0x9ab   :  { %1285 = vpow2.f32 %v108_v45 }
 0x9ac   :  { %1287 = vpow2.f32 %v1188_v48 }
 0x9b4   :  { %v1284_v37 = vpop.eup %1283 }
 0x9b5   :  { %496 = vrot.lane.b32.xlu1 %v1284_v37, %s1447_s2  ;;  %v1286_v47 = vpop.eup %1285 }
 0x9b6   :  { %512 = vrot.lane.b32.xlu0 %v1286_v47, %s1449_s24  ;;  %v1288_v49 = vpop.eup %1287 }
 0x9b7   :  { %v490_v50 = vadd.f32 1.0, %v1288_v49 }
 0x9b9   :  { %1289 = vrcp.f32 %v490_v50 }
 0x9c3   :  { %v1290_v51 = vpop.eup %1289 }
 0x9c4   :  { %v494_v54 = vmul.f32 %v1290_v51, %v1652_v60 }
 0xa27   :  { %v497_v52 = vpop.permute.xlu1 %496 }
 0xa28   :  { %v499_v53 = vmul.f32 %v1290_v51, %v497_v52  ;;  %v513_v59 = vpop.permute.xlu0 %512 }
 0xa2a   :  { %501 = vrot.lane.b32.xlu1 %v499_v53, %s1448_s23 }
 0xa9c   :  { %v502_v55 = vpop.permute.xlu1 %501 }
 0xa9d   :  { %v1680_v56 = vadd.f32 %v502_v55, %v494_v54 }
 0xa9f   :  { %1291 = vtanh.f32 %v1680_v56 }
 0xaa9   :  { %v1292_v57 = vpop.eup %1291 }
 0xaaa   :  { %507 = vrot.lane.b32.xlu1 %v1292_v57, %s1447_s2 }
 0xb1c   :  { %v508_v58 = vpop.permute.xlu1 %507 }
 0xb1d   :  { %v510_v61 = vmul.f32 %v1290_v51, %v508_v58 }
 0xb1f   :  { %v515_v62 = vmul.f32 %v513_v59, %v510_v61 }
 0xb21   :  { %v516_v63 = vpack.c.bf16 %v515_v62, %v515_v62 }
 0xb23   :  { %518 = vrot.lane.b32.xlu1 %v516_v63, %s1448_s23 }
 0xb95   :  { %v519_v6 = vpop.permute.xlu1 %518 }
 0xb96   :  { %1189 = vmatmul.mubr.msk.bf16.vlgmr.msra.gmra.mrb[4].mxu1 %vm184_vm0, %v519_v6 }
 0xb97   :  { %740 = vmatpush1.bf16.msra.mxu1 %v1540_v3  ;;  %771 = vmatprep.mubr.bf16.mxu1 %v1445_v0 }
 0xb98   :  { %741 = vmatprep.subr.bf16.mxu1 %v1546_v4 }
 0xb9b   :  { %742 = vmatpush1.bf16.msra.mxu1 %v1548_v5 }
 0xb9c   :  { %955 = vmatprep.subr.bf16.mxu1 %v1538_v2  ;;  %v1455_v2 = vmov 4  }
 0xc69   :  { %v557_v60 = vpop.f32.mrb[4].mxu1 }
 0xc6a   :  { %v559_v10 = vpop.f32.mrb[5].mxu1 }
 0xc6b   :  { %v564_v13 = vadd.f32 %v559_v10, %v1584_v24  ;;  %v561_v14 = vpop.f32.mrb[6].mxu1 }
 0xc6c   :  { %v562_v8 = vpop.f32.mrb[7].mxu1 }
 0xc6d   :  { %566 = vrot.lane.b32.xlu0 %v564_v13, %s1454_s27  ;;  %v1457_v8 = vmov 5  }
 0xc71   :  { %589 = vperm.xlu0 %1245, %v1579_v22  }
 0xc75   :  { %1247 = vset.pattern.permute.xlu0 %v1455_v2 }
 0xc76   :  { %111 = vperm.xlu0 %1247, %v1535_v1  }
 0xcdf   :  { %v1693_v15 = vpop.permute.xlu0 %566 }
 0xce0   :  { %v569_v16 = vmul.f32 %v1693_v15, %v1589_v27 }
 0xce2   :  { %v570_v17 = vadd.f32 %v569_v16, %v1596_v31 }
 0xce4   :  { %583 = vperm.xlu1 %1246, %v570_v17   ;;  %580 = vst.msk [vmem:[#allocation9] sm:$0xff] %vm579_vm4, %v570_v17 }
 0xce8   :  { %1248 = vset.pattern.permute.xlu1 %v1455_v2 }
 0xcf0   :  { %v590_v18 = vpop.permute.xlu0 %589 }
 0xcf1   :  { %v592_v23 = vmul.f32 %v590_v18, %v1609_v39 }
 0xcf5   :  { %v112_v34 = vpop.permute.xlu0 %111 }
 0xcf6   :  { %v114_v35 = vmul.f32 %v112_v34, %v1566_v11 }
 0xcf8   :  { %v115_v36 = vadd.f32 %v114_v35, %v1569_v12 }
 0xcfa   :  { %v116_v37 = vmax.f32 %v115_v36, 0.0 }
 0xcfc   :  { %v117_v40 = vsub.f32 0.0, %v116_v37 }
 0xcfe   :  { %v118_v41 = vmul.f32 1.442695, %v117_v40 }
 0xd63   :  { %v584_v20 = vpop.permute.xlu1 %583 }
 0xd64   :  { %v586_v21 = vmul.f32 %v584_v20, %v1606_v38 }
 0xd66   :  { %v587_v26 = vadd.f32 %v586_v21, %v557_v60 }
 0xd68   :  { %v593_v30 = vadd.f32 %v592_v23, %v587_v26 }
 0xd6a   :  { %v594_v32 = vadd.f32 %v593_v30, %v1615_v46 }
 0xd6c   :  { %1293 = vtanh.f32 %v594_v32  ;;  %v1190_v43 = vmul.f32 -1.442695, %v594_v32 }
 0xd6d   :  { %1295 = vpow2.f32 %v118_v41 }
 0xd6e   :  { %1297 = vpow2.f32 %v1190_v43 }
 0xd76   :  { %v1294_v33 = vpop.eup %1293 }
 0xd77   :  { %604 = vrot.lane.b32.xlu1 %v1294_v33, %s1447_s2  ;;  %v1296_v42 = vpop.eup %1295 }
 0xd78   :  { %620 = vrot.lane.b32.xlu0 %v1296_v42, %s1449_s24  ;;  %v1298_v44 = vpop.eup %1297 }
 0xd79   :  { %v598_v45 = vadd.f32 1.0, %v1298_v44 }
 0xd7b   :  { %1299 = vrcp.f32 %v598_v45 }
 0xd85   :  { %v1300_v47 = vpop.eup %1299 }
 0xd86   :  { %v602_v50 = vmul.f32 %v1300_v47, %v1680_v56 }
 0xde9   :  { %v605_v48 = vpop.permute.xlu1 %604 }
 0xdea   :  { %v607_v49 = vmul.f32 %v1300_v47, %v605_v48  ;;  %v621_v55 = vpop.permute.xlu0 %620 }
 0xdec   :  { %609 = vrot.lane.b32.xlu1 %v607_v49, %s1448_s23 }
 0xe5e   :  { %v610_v51 = vpop.permute.xlu1 %609 }
 0xe5f   :  { %v612_v52 = vadd.f32 %v610_v51, %v602_v50 }
 0xe61   :  { %1301 = vtanh.f32 %v612_v52 }
 0xe6b   :  { %v1302_v53 = vpop.eup %1301 }
 0xe6c   :  { %615 = vrot.lane.b32.xlu1 %v1302_v53, %s1447_s2 }
 0xede   :  { %v616_v54 = vpop.permute.xlu1 %615 }
 0xedf   :  { %v618_v57 = vmul.f32 %v1300_v47, %v616_v54 }
 0xee1   :  { %v623_v58 = vmul.f32 %v621_v55, %v618_v57 }
 0xee3   :  { %v624_v59 = vpack.c.bf16 %v623_v58, %v623_v58 }
 0xee5   :  { %626 = vrot.lane.b32.xlu1 %v624_v59, %s1448_s23 }
 0xf57   :  { %v627_v61 = vpop.permute.xlu1 %626 }
 0xf58   :  { %1191 = vmatmul.mubr.msk.bf16.vlgmr.msra.gmra.mrb[8].mxu0 %vm184_vm0, %v627_v61 }
 0xf59   :  { %848 = vmatpush1.bf16.msra.mxu0 %v1540_v3  ;;  %879 = vmatprep.mubr.bf16.mxu0 %v1445_v0 }
 0xf5a   :  { %849 = vmatprep.subr.bf16.mxu0 %v1546_v4 }
 0xf5d   :  { %850 = vmatpush1.bf16.msra.mxu0 %v1548_v5 }
0x102b   :  { %v665_v56 = vpop.f32.mrb[8].mxu0 }
0x102c   :  { %v667_v62 = vpop.f32.mrb[9].mxu0 }
0x102d   :  { %v672_v63 = vadd.f32 %v667_v62, %v1584_v24  ;;  %v669_v6 = vpop.f32.mrb[10].mxu0 }
0x102e   :  { %v670_v60 = vpop.f32.mrb[11].mxu0 }
0x102f   :  { %674 = vrot.lane.b32.xlu0 %v672_v63, %s1456_s28 }
0x1033   :  { %697 = vperm.xlu0 %1247, %v1579_v22  }
0x1037   :  { %1249 = vset.pattern.permute.xlu0 %v1457_v8 }
0x1038   :  { %121 = vperm.xlu0 %1249, %v1535_v1  }
0x10a1   :  { %v1717_v10 = vpop.permute.xlu0 %674 }
0x10a2   :  { %v677_v13 = vmul.f32 %v1717_v10, %v1589_v27 }
0x10a4   :  { %v678_v14 = vadd.f32 %v677_v13, %v1596_v31 }
0x10a6   :  { %691 = vperm.xlu1 %1248, %v678_v14   ;;  %688 = vst.msk [vmem:[#allocation9] sm:$0xff] %vm687_vm5, %v678_v14 }
0x10aa   :  { %1250 = vset.pattern.permute.xlu1 %v1457_v8 }
0x10b2   :  { %v698_v16 = vpop.permute.xlu0 %697 }
0x10b3   :  { %v700_v18 = vmul.f32 %v698_v16, %v1609_v39 }
0x10b7   :  { %v122_v30 = vpop.permute.xlu0 %121 }
0x10b8   :  { %v124_v32 = vmul.f32 %v122_v30, %v1566_v11 }
0x10ba   :  { %v125_v33 = vadd.f32 %v124_v32, %v1569_v12 }
0x10bc   :  { %v126_v34 = vmax.f32 %v125_v33, 0.0 }
0x10be   :  { %v127_v35 = vsub.f32 0.0, %v126_v34 }
0x10c0   :  { %v128_v36 = vmul.f32 1.442695, %v127_v35 }
0x1125   :  { %v692_v17 = vpop.permute.xlu1 %691 }
0x1126   :  { %v694_v2 = vmul.f32 %v692_v17, %v1606_v38 }
0x1128   :  { %v695_v20 = vadd.f32 %v694_v2, %v665_v56 }
0x112a   :  { %v701_v21 = vadd.f32 %v700_v18, %v695_v20 }
0x112c   :  { %v702_v23 = vadd.f32 %v701_v21, %v1615_v46 }
0x112e   :  { %1303 = vtanh.f32 %v702_v23  ;;  %v1192_v40 = vmul.f32 -1.442695, %v702_v23 }
0x112f   :  { %1305 = vpow2.f32 %v128_v36 }
0x1130   :  { %1307 = vpow2.f32 %v1192_v40 }
0x1138   :  { %v1304_v26 = vpop.eup %1303 }
0x1139   :  { %712 = vrot.lane.b32.xlu1 %v1304_v26, %s1447_s2  ;;  %v1306_v37 = vpop.eup %1305 }
0x113a   :  { %728 = vrot.lane.b32.xlu0 %v1306_v37, %s1449_s24  ;;  %v1308_v41 = vpop.eup %1307 }
0x113b   :  { %v706_v42 = vadd.f32 1.0, %v1308_v41 }
0x113d   :  { %1309 = vrcp.f32 %v706_v42 }
0x1147   :  { %v1310_v43 = vpop.eup %1309 }
0x1148   :  { %v710_v47 = vmul.f32 %v1310_v43, %v612_v52 }
0x11ab   :  { %v713_v44 = vpop.permute.xlu1 %712 }
0x11ac   :  { %v715_v45 = vmul.f32 %v1310_v43, %v713_v44  ;;  %v729_v53 = vpop.permute.xlu0 %728 }
0x11ae   :  { %717 = vrot.lane.b32.xlu1 %v715_v45, %s1448_s23 }
0x1220   :  { %v718_v48 = vpop.permute.xlu1 %717 }
0x1221   :  { %v720_v49 = vadd.f32 %v718_v48, %v710_v47 }
0x1223   :  { %1311 = vtanh.f32 %v720_v49 }
0x122d   :  { %v1312_v50 = vpop.eup %1311 }
0x122e   :  { %723 = vrot.lane.b32.xlu1 %v1312_v50, %s1447_s2 }
0x12a0   :  { %v724_v51 = vpop.permute.xlu1 %723 }
0x12a1   :  { %v726_v54 = vmul.f32 %v1310_v43, %v724_v51 }
0x12a3   :  { %v731_v55 = vmul.f32 %v729_v53, %v726_v54 }
0x12a5   :  { %v732_v57 = vpack.c.bf16 %v731_v55, %v731_v55 }
0x12a7   :  { %734 = vrot.lane.b32.xlu1 %v732_v57, %s1448_s23 }
0x1319   :  { %v735_v58 = vpop.permute.xlu1 %734 }
0x131a   :  { %1193 = vmatmul.mubr.msk.bf16.vlgmr.msra.gmra.mrb[8].mxu1 %vm184_vm0, %v735_v58 }
0x131b   :  { %956 = vmatpush1.bf16.msra.mxu1 %v1540_v3  ;;  %987 = vmatprep.mubr.bf16.mxu1 %v1445_v0 }
0x131c   :  { %957 = vmatprep.subr.bf16.mxu1 %v1546_v4  ;;  %v1459_v4 = vmov 6  }
0x131f   :  { %958 = vmatpush1.bf16.msra.mxu1 %v1548_v5 }
0x13ed   :  { %v773_v52 = vpop.f32.mrb[8].mxu1 }
0x13ee   :  { %v775_v59 = vpop.f32.mrb[9].mxu1 }
0x13ef   :  { %v780_v61 = vadd.f32 %v775_v59, %v1584_v24  ;;  %v777_v56 = vpop.f32.mrb[10].mxu1 }
0x13f0   :  { %v778_v62 = vpop.f32.mrb[11].mxu1 }
0x13f1   :  { %782 = vrot.lane.b32.xlu0 %v780_v61, %s1458_s29  ;;  %v1461_v61 = vmov 7  }
0x13f5   :  { %805 = vperm.xlu0 %1249, %v1579_v22  }
0x13f9   :  { %1251 = vset.pattern.permute.xlu0 %v1459_v4 }
0x13fa   :  { %131 = vperm.xlu0 %1251, %v1535_v1  }
0x1463   :  { %v1740_v63 = vpop.permute.xlu0 %782 }
0x1464   :  { %v785_v3 = vmul.f32 %v1740_v63, %v1589_v27 }
0x1466   :  { %v786_v0 = vadd.f32 %v785_v3, %v1596_v31 }
0x1468   :  { %799 = vperm.xlu1 %1250, %v786_v0   ;;  %796 = vst.msk [vmem:[#allocation9] sm:$0xff] %vm795_vm6, %v786_v0 }
0x146c   :  { %1252 = vset.pattern.permute.xlu1 %v1459_v4 }
0x1474   :  { %v806_v5 = vpop.permute.xlu0 %805 }
0x1475   :  { %v808_v13 = vmul.f32 %v806_v5, %v1609_v39 }
0x1479   :  { %v132_v2 = vpop.permute.xlu0 %131 }
0x147a   :  { %v134_v18 = vmul.f32 %v132_v2, %v1566_v11 }
0x147c   :  { %v135_v20 = vadd.f32 %v134_v18, %v1569_v12 }
0x147e   :  { %v136_v21 = vmax.f32 %v135_v20, 0.0 }
0x1480   :  { %v137_v23 = vsub.f32 0.0, %v136_v21 }
0x1482   :  { %v138_v26 = vmul.f32 1.442695, %v137_v23 }
0x14e7   :  { %v800_v6 = vpop.permute.xlu1 %799 }
0x14e8   :  { %v802_v60 = vmul.f32 %v800_v6, %v1606_v38 }
0x14ea   :  { %v803_v14 = vadd.f32 %v802_v60, %v773_v52 }
0x14ec   :  { %v809_v8 = vadd.f32 %v808_v13, %v803_v14 }
0x14ee   :  { %v810_v16 = vadd.f32 %v809_v8, %v1615_v46 }
0x14f0   :  { %1313 = vtanh.f32 %v810_v16  ;;  %v1194_v32 = vmul.f32 -1.442695, %v810_v16 }
0x14f1   :  { %1315 = vpow2.f32 %v138_v26 }
0x14f2   :  { %1317 = vpow2.f32 %v1194_v32 }
0x14fa   :  { %v1314_v17 = vpop.eup %1313 }
0x14fb   :  { %820 = vrot.lane.b32.xlu1 %v1314_v17, %s1447_s2  ;;  %v1316_v30 = vpop.eup %1315 }
0x14fc   :  { %836 = vrot.lane.b32.xlu0 %v1316_v30, %s1449_s24  ;;  %v1318_v33 = vpop.eup %1317 }
0x14fd   :  { %v814_v34 = vadd.f32 1.0, %v1318_v33 }
0x14ff   :  { %1319 = vrcp.f32 %v814_v34 }
0x1509   :  { %v1320_v35 = vpop.eup %1319 }
0x150a   :  { %v818_v40 = vmul.f32 %v1320_v35, %v720_v49 }
0x156d   :  { %v821_v36 = vpop.permute.xlu1 %820 }
0x156e   :  { %v823_v37 = vmul.f32 %v1320_v35, %v821_v36  ;;  %v837_v45 = vpop.permute.xlu0 %836 }
0x1570   :  { %825 = vrot.lane.b32.xlu1 %v823_v37, %s1448_s23 }
0x15e2   :  { %v826_v41 = vpop.permute.xlu1 %825 }
0x15e3   :  { %v828_v42 = vadd.f32 %v826_v41, %v818_v40 }
0x15e5   :  { %1321 = vtanh.f32 %v828_v42 }
0x15ef   :  { %v1322_v43 = vpop.eup %1321 }
0x15f0   :  { %831 = vrot.lane.b32.xlu1 %v1322_v43, %s1447_s2 }
0x1662   :  { %v832_v44 = vpop.permute.xlu1 %831 }
0x1663   :  { %v834_v47 = vmul.f32 %v1320_v35, %v832_v44 }
0x1665   :  { %v839_v48 = vmul.f32 %v837_v45, %v834_v47 }
0x1667   :  { %v840_v50 = vpack.c.bf16 %v839_v48, %v839_v48 }
0x1669   :  { %842 = vrot.lane.b32.xlu1 %v840_v50, %s1448_s23 }
0x16db   :  { %v843_v51 = vpop.permute.xlu1 %842 }
0x16dc   :  { %1195 = vmatmul.mubr.msk.bf16.vlgmr.msra.gmra.mrb[12].mxu0 %vm184_vm0, %v843_v51 }
0x17af   :  { %v881_v53 = vpop.f32.mrb[12].mxu0 }
0x17b0   :  { %v883_v54 = vpop.f32.mrb[13].mxu0 }
0x17b1   :  { %v888_v49 = vadd.f32 %v883_v54, %v1584_v24  ;;  %v885_v55 = vpop.f32.mrb[14].mxu0 }
0x17b2   :  { %v886_v57 = vpop.f32.mrb[15].mxu0 }
0x17b3   :  { %890 = vrot.lane.b32.xlu0 %v888_v49, %s1460_s30 }
0x17b7   :  { %913 = vperm.xlu0 %1251, %v1579_v22  }
0x17bb   :  { %1253 = vset.pattern.permute.xlu0 %v1461_v61 }
0x17bc   :  { %141 = vperm.xlu0 %1253, %v1535_v1  }
0x1825   :  { %v1759_v58 = vpop.permute.xlu0 %890 }
0x1826   :  { %v893_v52 = vmul.f32 %v1759_v58, %v1589_v27 }
0x1828   :  { %v894_v59 = vadd.f32 %v893_v52, %v1596_v31 }
0x182a   :  { %907 = vperm.xlu1 %1252, %v894_v59   ;;  %904 = vst.msk [vmem:[#allocation9] sm:$0xff] %vm903_vm7, %v894_v59 }
0x182e   :  { %1254 = vset.pattern.permute.xlu1 %v1461_v61 }
0x1836   :  { %v914_v56 = vpop.permute.xlu0 %913 }
0x1837   :  { %v916_v0 = vmul.f32 %v914_v56, %v1609_v39 }
0x183b   :  { %v142_v13 = vpop.permute.xlu0 %141 }
0x183c   :  { %v144_v14 = vmul.f32 %v142_v13, %v1566_v11 }
0x183e   :  { %v145_v8 = vadd.f32 %v144_v14, %v1569_v12 }
0x1840   :  { %v146_v1 = vmax.f32 %v145_v8, 0.0 }
0x1842   :  { %v147_v16 = vsub.f32 0.0, %v146_v1 }
0x1844   :  { %v148_v17 = vmul.f32 1.442695, %v147_v16 }
0x18a9   :  { %v908_v62 = vpop.permute.xlu1 %907 }
0x18aa   :  { %v910_v3 = vmul.f32 %v908_v62, %v1606_v38 }
0x18ac   :  { %v911_v4 = vadd.f32 %v910_v3, %v881_v53 }
0x18ae   :  { %v917_v5 = vadd.f32 %v916_v0, %v911_v4 }
0x18b0   :  { %v918_v6 = vadd.f32 %v917_v5, %v1615_v46 }
0x18b2   :  { %1323 = vtanh.f32 %v918_v6  ;;  %v1196_v18 = vmul.f32 -1.442695, %v918_v6 }
0x18b3   :  { %1325 = vpow2.f32 %v148_v17 }
0x18b4   :  { %1327 = vpow2.f32 %v1196_v18 }
0x18bc   :  { %v1324_v60 = vpop.eup %1323 }
0x18bd   :  { %928 = vrot.lane.b32.xlu1 %v1324_v60, %s1447_s2  ;;  %v1326_v2 = vpop.eup %1325  ;;  %v151_v60 = vsel %vm150_vm9, %v1579_v22, 0.0 }
0x18be   :  { %944 = vrot.lane.b32.xlu0 %v1326_v2, %s1449_s24  ;;  %v1328_v20 = vpop.eup %1327  ;;  %v152_v13 = vrot.slane %v151_v60, 4 }
0x18bf   :  { %v922_v21 = vadd.f32 1.0, %v1328_v20  ;;  %v355_v20 = vsub.f32 %v1586_v25, %v1637_v28 }
0x18c0   :  { %v153_v14 = vadd.f32 %v152_v13, %v151_v60 }
0x18c1   :  { %1329 = vrcp.f32 %v922_v21 }
0x18c2   :  { %v154_v8 = vrot.slane %v153_v14, 2 }
0x18cb   :  { %v1330_v23 = vpop.eup %1329 }
0x18cc   :  { %v926_v11 = vmul.f32 %v1330_v23, %v828_v42 }
0x192f   :  { %v929_v26 = vpop.permute.xlu1 %928 }
0x1930   :  { %v931_v30 = vmul.f32 %v1330_v23, %v929_v26  ;;  %v945_v35 = vpop.permute.xlu0 %944  ;;  %v356_v26 = vand.u32 2147483647, %v355_v20 }
0x1932   :  { %933 = vrot.lane.b32.xlu1 %v931_v30, %s1448_s23  ;;  %v1355_v30 = vld [vmem:[#allocation2] sm:$0xff] }
0x1933   :  { %v571_v25 = vsub.f32 %v1355_v30, %v1693_v15 }
0x19a4   :  { %v934_v32 = vpop.permute.xlu1 %933 }
0x19a5   :  { %v936_v12 = vadd.f32 %v934_v32, %v926_v11  ;;  %v463_v11 = vsub.f32 %v1355_v30, %v1665_v19  ;;  %v1356_v32 = vld [vmem:[#allocation2 + $0x8] sm:$0xff]  ;;  %v787_v19 = vsub.f32 %v1355_v30, %v1740_v63 }
0x19a7   :  { %1331 = vtanh.f32 %v936_v12 }
0x19b1   :  { %v1332_v33 = vpop.eup %1331 }
0x19b2   :  { %939 = vrot.lane.b32.xlu1 %v1332_v33, %s1447_s2  ;;  %v464_v33 = vand.u32 2147483647, %v463_v11 }
0x1a24   :  { %v940_v34 = vpop.permute.xlu1 %939 }
0x1a25   :  { %v942_v36 = vmul.f32 %v1330_v23, %v940_v34  ;;  %v572_v34 = vand.u32 2147483647, %v571_v25 }
0x1a27   :  { %v947_v37 = vmul.f32 %v945_v35, %v942_v36  ;;  %v679_v35 = vsub.f32 %v1355_v30, %v1717_v10 }
0x1a29   :  { %v948_v40 = vpack.c.bf16 %v947_v37, %v947_v37  ;;  %v680_v37 = vand.u32 2147483647, %v679_v35 }
0x1a2b   :  { %950 = vrot.lane.b32.xlu1 %v948_v40, %s1448_s23 }
0x1a9d   :  { %v951_v41 = vpop.permute.xlu1 %950 }
0x1a9e   :  { %1197 = vmatmul.mubr.msk.bf16.vlgmr.msra.gmra.mrb[12].mxu1 %vm184_vm0, %v951_v41  ;;  %v788_v41 = vand.u32 2147483647, %v787_v19 }
0x1b71   :  { %v989_v43 = vpop.f32.mrb[12].mxu1 }
0x1b72   :  { %v991_v44 = vpop.f32.mrb[13].mxu1 }
0x1b73   :  { %v996_v42 = vadd.f32 %v991_v44, %v1584_v24  ;;  %v993_v45 = vpop.f32.mrb[14].mxu1 }
0x1b74   :  { %v994_v47 = vpop.f32.mrb[15].mxu1 }
0x1b75   :  { %998 = vrot.lane.b32.xlu0 %v996_v42, %s1462_s7 }
0x1b79   :  { %1021 = vperm.xlu0 %1253, %v1579_v22   ;;  %v1799_v22 = vld [vmem:[%s1850_s1] sm:$0xff]  ;;  %s1464_s1 = smov 126  }
0x1be7   :  { %v1778_v48 = vpop.permute.xlu0 %998 }
0x1be8   :  { %v1001_v50 = vmul.f32 %v1778_v48, %v1589_v27  ;;  %v1003_v42 = vsub.f32 %v1355_v30, %v1778_v48  ;;  %v238_v48 = vsub.f32 %v1355_v30, %v1592_v29 }
0x1bea   :  { %v1002_v51 = vadd.f32 %v1001_v50, %v1596_v31  ;;  %v1004_v10 = vand.u32 2147483647, %v1003_v42 }
0x1bec   :  { %1015 = vperm.xlu1 %1254, %v1002_v51   ;;  %1012 = vst.msk [vmem:[#allocation9] sm:$0xff] %vm1011_vm8, %v1002_v51 }
0x1bf8   :  { %v1022_v53 = vpop.permute.xlu0 %1021 }
0x1bf9   :  { %v1024_v55 = vmul.f32 %v1022_v53, %v1609_v39 }
0x1c6b   :  { %v1016_v54 = vpop.permute.xlu1 %1015 }
0x1c6c   :  { %v1018_v49 = vmul.f32 %v1016_v54, %v1606_v38  ;;  %v1063_v38 = vsub.s32 5, %v1556_v7  ;;  %v155_v7 = vadd.f32 %v154_v8, %v153_v14 }
0x1c6e   :  { %v1019_v57 = vadd.f32 %v1018_v49, %v989_v43  ;;  %v1064_v39 = vrot.slane %v1562_v9, %v1063_v38  ;;  %v156_v1 = vrot.slane %v155_v7, 1  ;;  %v895_v43 = vsub.f32 %v1355_v30, %v1759_v58 }
0x1c6f   :  { %v239_v49 = vand.u32 2147483647, %v238_v48 }
0x1c70   :  { %v1025_v52 = vadd.f32 %v1024_v55, %v1019_v57  ;;  %v157_v16 = vadd.f32 %v156_v1, %v155_v7  ;;  %v896_v44 = vand.u32 2147483647, %v895_v43 }
0x1c72   :  { %v1026_v59 = vadd.f32 %v1025_v52, %v1615_v46  ;;  %v158_v17 = vadd.f32 1e-05, %v157_v16 }
0x1c74   :  { %1333 = vtanh.f32 %v1026_v59  ;;  %v1198_v27 = vmul.f32 -1.442695, %v1026_v59 }
0x1c76   :  { %1335 = vpow2.f32 %v1198_v27 }
0x1c7e   :  { %v1334_v61 = vpop.eup %1333 }
0x1c7f   :  { %1036 = vrot.lane.b32.xlu1 %v1334_v61, %s1447_s2 }
0x1c80   :  { %v1336_v56 = vpop.eup %1335 }
0x1c81   :  { %v1030_v31 = vadd.f32 1.0, %v1336_v56 }
0x1c83   :  { %1337 = vrcp.f32 %v1030_v31 }
0x1c8d   :  { %v1338_v62 = vpop.eup %1337 }
0x1c8e   :  { %v1034_v46 = vmul.f32 %v1338_v62, %v936_v12 }
0x1cf1   :  { %v1037_v3 = vpop.permute.xlu1 %1036 }
0x1cf2   :  { %v1039_v0 = vmul.f32 %v1338_v62, %v1037_v3 }
0x1cf4   :  { %1041 = vrot.lane.b32.xlu0 %v1039_v0, %s1448_s23 }
0x1cf8   :  { %1066 = vrot.lane.b32.xlu0 %v1064_v39, %s1449_s24 }
0x1d66   :  { %v1042_v4 = vpop.permute.xlu0 %1041 }
0x1d67   :  { %v1044_v5 = vadd.f32 %v1042_v4, %v1034_v46 }
0x1d69   :  { %1339 = vtanh.f32 %v1044_v5 }
0x1d6a   :  { %1341 = vrcp.f32 %v158_v17  ;;  %v1067_v2 = vpop.permute.xlu0 %1066 }
0x1d73   :  { %v1340_v6 = vpop.eup %1339 }
0x1d74   :  { %1047 = vrot.lane.b32.xlu1 %v1340_v6, %s1447_s2  ;;  %v1342_v23 = vpop.eup %1341 }
0x1d75   :  { %v161_v12 = vmul.f32 %v1356_v32, %v1342_v23 }
0x1d77   :  { %v357_v28 = vmul.f32 %v356_v26, %v161_v12  ;;  %v465_v36 = vmul.f32 %v464_v33, %v161_v12  ;;  %v573_v40 = vmul.f32 %v572_v34, %v161_v12  ;;  %v681_v15 = vmul.f32 %v680_v37, %v161_v12 }
0x1d78   :  { %v789_v45 = vmul.f32 %v788_v41, %v161_v12  ;;  %v897_v47 = vmul.f32 %v896_v44, %v161_v12  ;;  %v1005_v63 = vmul.f32 %v1004_v10, %v161_v12  ;;  %v240_v57 = vmul.f32 %v239_v49, %v161_v12 }
0x1de6   :  { %v1048_v9 = vpop.permute.xlu1 %1047 }
0x1de7   :  { %v1050_v18 = vmul.f32 %v1338_v62, %v1048_v9 }
0x1de9   :  { %v1069_v21 = vmul.f32 %v1067_v2, %v1050_v18 }
0x1deb   :  { %1071 = vrot.lane.b32.xlu1 %v1069_v21, %s1448_s23 }
0x1def   :  { %1082 = vrot.lane.b32.xlu1 %v1799_v22, %s1450_s25 }
0x1df3   :  { %359 = vrot.lane.b32.xlu1 %v357_v28, %s1463_s10 }
0x1df7   :  { %467 = vrot.lane.b32.xlu1 %v465_v36, %s1464_s1 }
0x1dfb   :  { %575 = vrot.lane.b32.xlu1 %v573_v40, %s1465_s11 }
0x1dff   :  { %683 = vrot.lane.b32.xlu1 %v681_v15, %s1466_s12 }
0x1e03   :  { %791 = vrot.lane.b32.xlu1 %v789_v45, %s1467_s13 }
0x1e07   :  { %899 = vrot.lane.b32.xlu1 %v897_v47, %s1468_s14 }
0x1e0b   :  { %1007 = vrot.lane.b32.xlu1 %v1005_v63, %s1469_s15 }
0x1e0f   :  { %1113 = vrot.lane.b32.xlu1 %v1799_v22, %s1463_s10 }
0x1e5d   :  { %v1072_v58 = vpop.permute.xlu1 %1071 }
0x1e5e   :  { %v1074_v50 = vsel %vm184_vm0, %v1072_v58, 0.0 }
0x1e5f   :  { %1075 = vadd.xlane.f32.xlu0 %v1074_v50 }
0x1e61   :  { %v1083_v51 = vpop.permute.xlu1 %1082 }
0x1e65   :  { %v360_v53 = vpop.permute.xlu1 %359 }
0x1e66   :  { %v362_v59 = vadd.f32 %v360_v53, %v240_v57 }
0x1e69   :  { %v468_v54 = vpop.permute.xlu1 %467 }
0x1e6a   :  { %v470_v61 = vadd.f32 %v468_v54, %v362_v59 }
0x1e6d   :  { %v576_v55 = vpop.permute.xlu1 %575 }
0x1e6e   :  { %v578_v56 = vadd.f32 %v576_v55, %v470_v61 }
0x1e71   :  { %v684_v52 = vpop.permute.xlu1 %683 }
0x1e72   :  { %v686_v31 = vadd.f32 %v684_v52, %v578_v56 }
0x1e75   :  { %v792_v27 = vpop.permute.xlu1 %791 }
0x1e76   :  { %v794_v3 = vadd.f32 %v792_v27, %v686_v31 }
0x1e79   :  { %v900_v62 = vpop.permute.xlu1 %899 }
0x1e7a   :  { %v902_v0 = vadd.f32 %v900_v62, %v794_v3 }
0x1e7d   :  { %v1008_v38 = vpop.permute.xlu1 %1007 }
0x1e7e   :  { %v1010_v39 = vadd.f32 %v1008_v38, %v902_v0 }
0x1e80   :  { %v1051_v46 = vsel %vm242_vm1, %v1010_v39, 0.0 }
0x1e81   :  { %1052 = vadd.xlane.f32.xlu1 %v1051_v46  ;;  %v1114_v4 = vpop.permute.xlu1 %1113 }
0x1e82   :  { %v1116_v29 = vsel %vm242_vm1, %v1114_v4, 0.0 }
0x1e85   :  { %1117 = vadd.xlane.f32.xlu1 %v1116_v29 }
0x1eec   :  { %v1076_v5 = vpop.xlane.xlu0 %1075 }
0x1eed   :  { %v1077_v6 = vadd.f32 %v1076_v5, %v1584_v24 }
0x1eef   :  { %v1079_v60 = vsub.f32 0.0, %v1077_v6  ;;  %v1199_v13 = vmul.f32 -1.442695, %v1077_v6  ;;  %v1085_v23 = vmul.f32 %v1083_v51, %v1077_v6 }
0x1ef1   :  { %v1080_v14 = vmax.f32 %v1079_v60, 0.0  ;;  %1343 = vpow2.f32 %v1199_v13  ;;  %v1086_v24 = vsub.f32 %v1077_v6, %v1085_v23 }
0x1ef3   :  { %v1088_v8 = vsub.f32 0.0, %v1080_v14  ;;  %v1091_v7 = vsub.f32 %v1079_v60, %v1080_v14  ;;  %v1087_v32 = vadd.f32 %v1086_v24, %v1080_v14 }
0x1ef5   :  { %v1089_v1 = vmul.f32 1.442695, %v1088_v8  ;;  %v1092_v16 = vmul.f32 1.442695, %v1091_v7 }
0x1ef7   :  { %1345 = vpow2.f32 %v1089_v1 }
0x1ef8   :  { %1347 = vpow2.f32 %v1092_v16 }
0x1efb   :  { %v1344_v17 = vpop.eup %1343 }
0x1efc   :  { %v1138_v9 = vadd.f32 1.0, %v1344_v17 }
0x1efe   :  { %1349 = vrcp.f32 %v1138_v9 }
0x1f01   :  { %v1346_v2 = vpop.eup %1345 }
0x1f02   :  { %v1348_v18 = vpop.eup %1347 }
0x1f03   :  { %v1094_v20 = vadd.f32 %v1348_v18, %v1346_v2 }
0x1f05   :  { %1351 = vlog2.f32 %v1094_v20 }
0x1f08   :  { %v1350_v21 = vpop.eup %1349 }
0x1f09   :  { %1142 = vrot.lane.b32.xlu1 %v1350_v21, %s1463_s10 }
0x1f0e   :  { %v1053_v26 = vpop.xlane.xlu1 %1052 }
0x1f0f   :  { %v1352_v30 = vpop.eup %1351  ;;  %v1054_v11 = vrot.slane %v1053_v26, 4 }
0x1f10   :  { %v1096_v12 = vmul.f32 0.6931472, %v1352_v30 }
0x1f11   :  { %v1055_v33 = vadd.f32 %v1054_v11, %v1053_v26 }
0x1f12   :  { %v1097_v25 = vadd.f32 %v1096_v12, %v1087_v32  ;;  %v1118_v19 = vpop.xlane.xlu1 %1117 }
0x1f13   :  { %v1056_v28 = vrot.slane %v1055_v33, 2  ;;  %v1119_v15 = vrot.slane %v1118_v19, 4 }
0x1f14   :  { %v1098_v34 = vmul.f32 %v1097_v25, %v1799_v22 }
0x1f15   :  { %v1057_v35 = vadd.f32 %v1056_v28, %v1055_v33  ;;  %v1120_v44 = vadd.f32 %v1119_v15, %v1118_v19 }
0x1f16   :  { %1100 = vrot.lane.b32.xlu0 %v1098_v34, %s1463_s10 }
0x1f17   :  { %v1058_v36 = vrot.slane %v1057_v35, 1  ;;  %v1121_v22 = vrot.slane %v1120_v44, 2 }
0x1f19   :  { %v1059_v37 = vadd.f32 %v1058_v36, %v1057_v35  ;;  %v1122_v47 = vadd.f32 %v1121_v22, %v1120_v44 }
0x1f1b   :  { %1200 = vpush %v1059_v37 }
0x1f7b   :  { %v1143_v40 = vpop.permute.xlu1 %1142 }
0x1f7c   :  { %1145 = vst.msk [vmem:[%s1854_s5] sm:$0xff] %vm242_vm1, %v1143_v40 }
0x1f88   :  { %v1101_v41 = vpop.permute.xlu0 %1100 }
0x1f89   :  { %v1103_v43 = vsel %vm242_vm1, %v1101_v41, 0.0 }
0x1f8a   :  { %1104 = vadd.xlane.f32.xlu0 %v1103_v43 }
0x2017   :  { %v1105_v42 = vpop.xlane.xlu0 %1104 }
0x2018   :  { %v1106_v45 = vrot.slane %v1105_v42, 4 }
0x201a   :  { %v1107_v10 = vadd.f32 %v1106_v45, %v1105_v42 }
0x201c   :  { %v1108_v63 = vrot.slane %v1107_v10, 2 }
0x201d   :  { %1412 = shalt.err (!%p1409_p6)
}
0x201e   :  { %s1413_s21 = scalar_lea.hbm %s1855_s6, 128 }
0x201f   :  { %p1414_p7 = scmp.ne.s32.totalorder %s1855_s6, %s1413_s21  ;;  %p1417_p8 = scmp.lt.u32.totalorder %s1413_s21, %s1855_s6 }
0x2021   :  { %p1419_p9 = pnand %p1417_p8, %p1414_p7 }
0x2023   :  { %1422 = shalt.err (!%p1419_p9)
}
0x2024   :  { %1165 = dma.vmem_to_hbm [thread:$0]  %s1163_s19, 128, %s1855_s6, [#allocation4]   ;;  %v1109_v58 = vadd.f32 %v1108_v63, %v1107_v10  ;;  %v1123_v50 = vrot.slane %v1122_v47, 1 }
0x2025   :  { %s1201_s26 = spop %1200  ;;  %s1423_s1 = scalar_lea.hbm %s1853_s4, 16 }
0x2026   :  { %v1110_v51 = vrot.slane %v1109_v58, 1  ;;  %v1124_v48 = vadd.f32 %v1123_v50, %v1122_v47  ;;  %s1131_s30 = smul.f32 0.3, %s1201_s26  ;;  %p1424_p10 = scmp.ne.s32.totalorder %s1853_s4, %s1423_s1 }
0x2027   :  { %p1427_p11 = scmp.lt.u32.totalorder %s1423_s1, %s1853_s4 }
0x2028   :  { %v1111_v53 = vadd.f32 %v1110_v51, %v1109_v58 }
0x2029   :  { %p1429_p12 = pnand %p1427_p11, %p1424_p10 }
0x202a   :  { %1202 = vpush %v1111_v53 }
0x202b   :  { %1204 = vpush %v1124_v48 }
0x205b   :  { %s1203_s27 = spop %1202 }
0x205c   :  { %s1205_s28 = spop %1204 }
0x205d   :  { %s1126_s29 = sadd.f32 1e-05, %s1205_s28 }
0x205f   :  { %v1127_v54 = vstv %s1126_s29 }
0x2060   :  { %1353 = vrcp.f32 %v1127_v54 }
0x206a   :  { %v1354_v49 = vpop.eup %1353 }
0x206b   :  { %1206 = vpush %v1354_v49 }
0x209c   :  { %s1207_s7 = spop %1206 }
0x209d   :  { %s1130_s8 = smul.f32 %s1207_s7, %s1203_s27 }
0x209f   :  { %s1132_s9 = sadd.f32 %s1131_s30, %s1130_s8 }
0x20a1   :  { %1134 = sst [smem:[#allocation8]] %s1132_s9 }
0x20a2   :  { %1432 = shalt.err (!%p1429_p12)
}
0x20a3   :  { %s1471_s15 = smov [#allocation8]  }
0x20a4   :  { %1153 = dma.smem_to_hbm %s1471_s15, 16, %s1853_s4, [#allocation5]  }
0x20a5   :  { %1437 = dma.done.wait [#allocation5], 16  }
0x20a6   :  { %1438 = vsyncadd [#allocation5], 4294967280 }
0x20a7   :  { %1439 = dma.done.wait [#allocation4], 128  }
0x20a8   :  { %1440 = vsyncadd [#allocation4], 4294967168 }
0x20a9   :  { %1174 = sfence }
0x20aa   :  { %1175 = vsyncpa [#allocation3], 1 }
0x20ab   :  { %1176 = vsyncpa [#allocation7], 1 }
0x20ac   :  { %1177 = vsyncpa [#allocation4], 1 }
0x20ad   :  { %1178 = vsyncpa [#allocation5], 1 }

</bundles_post_ra>
